<compile_context>
chip_gen: v7x
topology: tpu7x:2x2x1
jax: 0.10.0
libtpu: 0.0.40
codegen_flags: <defaults>
</compile_context>

<pallas_src>
import jax
import jax.numpy as jnp
from jax import lax
from jax.experimental import pallas as pl
from jax.experimental.pallas import tpu as pltpu

N = 128          # catalog size (cos_sim_dim); the real model uses 4800
L = 32           # max_len (padded utf-8 title byte length)
K = 11           # torch.topk(scores, 11)
KPAD = 16        # padded top-k rows for the title gather (sublane friendly)
KLANE = 128      # lane-dense width of the scores output block

# Packed sort key: score bits in the high 19 bits, (PAYLOAD_MASK - lane) in the
# low 13 bits.  Exact because cos_sim values are half precision (<= 11
# significant mantissa bits, so the low 13 f32 mantissa bits are zero), and the
# payload makes equal scores break ties toward the lowest index (matches a
# stable descending sort).
PAYLOAD_BITS = 13
PAYLOAD_MASK = (1 << PAYLOAD_BITS) - 1        # 0x1FFF
HIGH_MASK = -(1 << PAYLOAD_BITS)              # ~0x1FFF as int32
SIGN_FIX = 0x7FFFFFFF
NEG_KEY = -(1 << 31)                          # strictly below every valid key
assert N <= PAYLOAD_MASK + 1


def recommender_kernel(query_ref, titles_ref, cos_ref, titles_out_ref, scores_out_ref):
    titles = titles_ref[...]                               # (N, L) int32
    query = query_ref[0]                                   # (1, L) int32

    # (original_titles == movie_title).all(-1)
    eq = (titles == query).astype(jnp.int32)               # (N, L)
    match = jnp.sum(eq, axis=-1, keepdims=True) == L       # (N, 1) bool

    # cos_sim[match].squeeze() as a single bf16 MXU pass: (1,N) @ (N,N).
    # Exact: the mask is 0/1 and cos_sim is already bf16; accumulation is f32.
    # TODO(synk): torch errors on zero matches and changes shape on multiple
    # matches; here zero matches -> all-zero scores, multiple -> summed rows.
    mask_row = match.astype(jnp.float32).reshape(1, N).astype(jnp.bfloat16)
    scores = jnp.dot(mask_row, cos_ref[...],
                     preferred_element_type=jnp.float32)   # (1, N) f32

    # Pack (score, lane) into one monotone-sortable int32 key.
    bits = pltpu.bitcast(scores, jnp.int32)
    sortable = bits ^ ((bits >> 31) & SIGN_FIX)            # total order as int32
    lane = lax.broadcasted_iota(jnp.int32, (1, N), 1)
    keys = (sortable & HIGH_MASK) | (PAYLOAD_MASK - lane)

    # Iterative top-k: ONE cross-lane reduction per step (value+index together).
    kslot_lane = lax.broadcasted_iota(jnp.int32, (1, KLANE), 1)
    kslot_sub = lax.broadcasted_iota(jnp.int32, (KPAD, 1), 0)
    top_row = jnp.full((1, KLANE), NEG_KEY, dtype=jnp.int32)   # keys across lanes
    top_col = jnp.full((KPAD, 1), NEG_KEY, dtype=jnp.int32)    # keys down sublanes
    for k in range(K):
        kmax = jnp.max(keys, axis=1, keepdims=True)            # (1, 1)
        top_row = jnp.where(kslot_lane == k, kmax, top_row)
        top_col = jnp.where(kslot_sub == k, kmax, top_col)
        keys = jnp.where(keys == kmax, NEG_KEY, keys)

    # Unpack the top-k scores; lane-dense (1, 128) store.
    hi = top_row & HIGH_MASK
    val_bits = jnp.where(hi < 0, (hi | PAYLOAD_MASK) ^ SIGN_FIX, hi)
    vals = pltpu.bitcast(val_bits, jnp.float32)
    scores_out_ref[0] = jnp.where(kslot_lane < K, vals, 0.0)

    # original_titles[top_indices] via a one-hot bf16 MXU gather.
    # Exact: byte values < 256 and one-hot rows have a single 1.0.
    top_idx = PAYLOAD_MASK - (top_col & PAYLOAD_MASK)          # (KPAD, 1)
    onehot = top_idx == lax.broadcasted_iota(jnp.int32, (KPAD, N), 1)
    gathered = jnp.dot(onehot.astype(jnp.bfloat16), titles.astype(jnp.bfloat16),
                       preferred_element_type=jnp.float32)     # (KPAD, L)
    titles_out_ref[0] = gathered.astype(jnp.int32)


@jax.jit
def recommend_batch(movie_titles, original_titles, cos_sim):
    """movie_titles (B, L) int32 -> ((B, 10, L) int32 titles, (B, 10) f16 scores)."""
    B = movie_titles.shape[0]
    titles_out, scores_out = pl.pallas_call(
        recommender_kernel,
        grid=(B,),
        in_specs=[
            pl.BlockSpec((1, 1, L), lambda b: (b, 0, 0)),      # one query per step
            pl.BlockSpec((N, L), lambda b: (0, 0)),            # resident titles
            # TODO(synk): at real catalog size (N~4800) tile cos_sim along the
            # lane axis and merge per-tile top-k partials instead of one block.
            pl.BlockSpec((N, N), lambda b: (0, 0)),            # resident cos_sim (bf16)
        ],
        out_specs=(
            pl.BlockSpec((1, KPAD, L), lambda b: (b, 0, 0)),
            pl.BlockSpec((1, 1, KLANE), lambda b: (b, 0, 0)),
        ),
        out_shape=(
            jax.ShapeDtypeStruct((B, KPAD, L), jnp.int32),
            jax.ShapeDtypeStruct((B, 1, KLANE), jnp.float32),
        ),
        compiler_params=pltpu.CompilerParams(
            dimension_semantics=("parallel",)),                # shard queries across TCs
    )(movie_titles.reshape(B, 1, L), original_titles, cos_sim)

    # torch: top.values[1:], top.indices[1:]  (drop the self match)
    top_titles = titles_out[:, 1:K, :]                         # (B, 10, L) int32
    # TODO(synk): torch stores cos_sim as float16; bf16 is the TPU-native
    # half-precision stand-in and scores are returned as float16 to match torch.
    top_scores = scores_out[:, 0, 1:K].astype(jnp.float16)     # (B, 10)
    return top_titles, top_scores


@jax.jit
def recommend(movie_title, original_titles, cos_sim):
    """Single-query forward, matching OverviewRecommender.forward()."""
    titles, scores = recommend_batch(movie_title.reshape(1, L),
                                     original_titles, cos_sim)
    return titles[0], scores[0]


if __name__ == "__main__":
    key = jax.random.PRNGKey(0)
    k1, k2 = jax.random.split(key)

    # deterministic synthetic buffers (stand-ins for the csv / torch.load buffers)
    original_titles = jax.random.randint(k1, (N, L), 1, 127, dtype=jnp.int32)
    a = jax.random.uniform(k2, (N, N), dtype=jnp.float32)
    cos = (a + a.T) * 0.5
    cos = cos.at[jnp.arange(N), jnp.arange(N)].set(1.0)        # self-similarity = 1
    cos_sim = cos.astype(jnp.bfloat16)                         # half-precision storage

    query_idx = jnp.array([5, 17, 42, 99], dtype=jnp.int32)
    movie_titles = original_titles[query_idx]                  # (B, L)

    top_titles, top_scores = recommend_batch(movie_titles, original_titles, cos_sim)
    jax.block_until_ready((top_titles, top_scores))

    # pure-JAX reference (same bf16 scores; stable sort breaks ties to low index)
    ok = True
    for b in range(int(query_idx.shape[0])):
        scores_ref = cos_sim[query_idx[b]].astype(jnp.float32)
        order = jnp.argsort(-scores_ref)[:K]
        ref_titles = original_titles[order][1:]
        ref_scores = scores_ref[order][1:].astype(jnp.float16)
        ok &= bool(jnp.array_equal(top_titles[b], ref_titles))
        ok &= bool(jnp.allclose(top_scores[b].astype(jnp.float32),
                                ref_scores.astype(jnp.float32), atol=1e-3))

    # single-query path (the module's forward signature)
    t1, s1 = recommend(movie_titles[0], original_titles, cos_sim)
    jax.block_until_ready((t1, s1))
    ok &= bool(jnp.array_equal(t1, top_titles[0]))
    ok &= bool(jnp.array_equal(s1, top_scores[0]))

    if not ok:
        raise SystemExit("MISMATCH vs pure-JAX reference")
    print("KERNEL_OK")
</pallas_src>

<mosaic_0001>
module attributes {stable_mosaic.version = 11 : i64} {
  func.func @recommender_kernel(%arg0: i32, %arg1: memref<1x1x32xi32, #tpu.memory_space<vmem>>, %arg2: memref<128x32xi32, #tpu.memory_space<vmem>>, %arg3: memref<128x128xbf16, #tpu.memory_space<vmem>>, %arg4: memref<1x16x32xi32, #tpu.memory_space<vmem>>, %arg5: memref<1x1x128xf32, #tpu.memory_space<vmem>>) attributes {dimension_semantics = [#tpu.dimension_semantics<parallel>], iteration_bounds = array<i64: 4>, scalar_prefetch = 0 : i64, scratch_operands = 0 : i64, tpu.core_type = #tpu.core_type<tc>, window_params = [{transform_indices = @transform_0, window_bounds = array<i64: 1, 1, 32>}, {pipeline_mode = #tpu.pipeline_mode<synchronous>, transform_indices = @transform_1, window_bounds = array<i64: 128, 32>}, {pipeline_mode = #tpu.pipeline_mode<synchronous>, transform_indices = @transform_2, window_bounds = array<i64: 128, 128>}, {transform_indices = @transform_3, window_bounds = array<i64: 1, 16, 32>}, {transform_indices = @transform_4, window_bounds = array<i64: 1, 1, 128>}]} {
    %c0 = arith.constant 0 : index
    %c0_0 = arith.constant 0 : index
    %0 = vector.load %arg2[%c0, %c0_0] : memref<128x32xi32, #tpu.memory_space<vmem>>, vector<128x32xi32>
    %c0_1 = arith.constant 0 : index
    %c0_2 = arith.constant 0 : index
    %c0_3 = arith.constant 0 : index
    %1 = vector.load %arg1[%c0_1, %c0_2, %c0_3] : memref<1x1x32xi32, #tpu.memory_space<vmem>>, vector<1x1x32xi32>
    %2 = vector.shape_cast %1 : vector<1x1x32xi32> to vector<1x32xi32>
    %3 = vector.broadcast %2 : vector<1x32xi32> to vector<128x32xi32>
    %4 = arith.cmpi eq, %0, %3 : vector<128x32xi32>
    %5 = arith.extui %4 : vector<128x32xi1> to vector<128x32xi32>
    %cst = arith.constant dense<0> : vector<128xi32>
    %6 = vector.multi_reduction <add>, %5, %cst [1] : vector<128x32xi32> to vector<128xi32>
    %7 = vector.shape_cast %6 : vector<128xi32> to vector<128x1xi32>
    %c32_i32 = arith.constant 32 : i32
    %8 = vector.broadcast %c32_i32 : i32 to vector<128x1xi32>
    %9 = arith.cmpi eq, %7, %8 : vector<128x1xi32>
    %10 = arith.extui %9 : vector<128x1xi1> to vector<128x1xi32>
    %11 = arith.sitofp %10 : vector<128x1xi32> to vector<128x1xf32>
    %12 = vector.shape_cast %11 : vector<128x1xf32> to vector<1x128xf32>
    %13 = arith.truncf %12 : vector<1x128xf32> to vector<1x128xbf16>
    %c0_4 = arith.constant 0 : index
    %c0_5 = arith.constant 0 : index
    %14 = vector.load %arg3[%c0_4, %c0_5] : memref<128x128xbf16, #tpu.memory_space<vmem>>, vector<128x128xbf16>
    %cst_6 = arith.constant dense<0.000000e+00> : vector<1x128xf32>
    %15 = tpu.matmul %13, %14, %cst_6 {dimension_numbers = #tpu.dot_dimension_numbers<[1], [0], [0], [1], [0, 0, 1, 1], [], []>} : vector<1x128xbf16>, vector<128x128xbf16>, vector<1x128xf32> -> vector<1x128xf32>
    %16 = tpu.bitcast %15 : vector<1x128xf32> -> vector<1x128xi32>
    %c31_i32 = arith.constant 31 : i32
    %17 = vector.broadcast %c31_i32 : i32 to vector<1x128xi32>
    %18 = arith.shrsi %16, %17 : vector<1x128xi32>
    %c2147483647_i32 = arith.constant 2147483647 : i32
    %19 = vector.broadcast %c2147483647_i32 : i32 to vector<1x128xi32>
    %20 = arith.andi %18, %19 : vector<1x128xi32>
    %21 = arith.xori %16, %20 : vector<1x128xi32>
    %22 = tpu.iota {dimensions = array<i32: 1>} : vector<1x128xi32>
    %c-8192_i32 = arith.constant -8192 : i32
    %23 = vector.broadcast %c-8192_i32 : i32 to vector<1x128xi32>
    %24 = arith.andi %21, %23 : vector<1x128xi32>
    %c8191_i32 = arith.constant 8191 : i32
    %25 = vector.broadcast %c8191_i32 : i32 to vector<1x128xi32>
    %26 = arith.subi %25, %22 : vector<1x128xi32>
    %27 = arith.ori %24, %26 : vector<1x128xi32>
    %28 = tpu.iota {dimensions = array<i32: 1>} : vector<1x128xi32>
    %29 = tpu.iota {dimensions = array<i32: 0>} : vector<16x1xi32>
    %c-2147483648_i32 = arith.constant -2147483648 : i32
    %30 = vector.broadcast %c-2147483648_i32 : i32 to vector<1x128xi32>
    %c-2147483648_i32_7 = arith.constant -2147483648 : i32
    %31 = vector.broadcast %c-2147483648_i32_7 : i32 to vector<16x1xi32>
    %cst_8 = arith.constant dense<-2147483648> : vector<1xi32>
    %32 = vector.multi_reduction <maxsi>, %27, %cst_8 [1] : vector<1x128xi32> to vector<1xi32>
    %33 = vector.shape_cast %32 : vector<1xi32> to vector<1x1xi32>
    %c0_i32 = arith.constant 0 : i32
    %34 = vector.broadcast %c0_i32 : i32 to vector<1x128xi32>
    %35 = arith.cmpi eq, %28, %34 : vector<1x128xi32>
    %36 = vector.shape_cast %33 : vector<1x1xi32> to vector<1x1xi32>
    %37 = vector.broadcast %36 : vector<1x1xi32> to vector<1x128xi32>
    %38 = arith.select %35, %37, %30 : vector<1x128xi1>, vector<1x128xi32>
    %c0_i32_9 = arith.constant 0 : i32
    %39 = vector.broadcast %c0_i32_9 : i32 to vector<16x1xi32>
    %40 = arith.cmpi eq, %29, %39 : vector<16x1xi32>
    %41 = vector.shape_cast %33 : vector<1x1xi32> to vector<1x1xi32>
    %42 = vector.broadcast %41 : vector<1x1xi32> to vector<16x1xi32>
    %43 = arith.select %40, %42, %31 : vector<16x1xi1>, vector<16x1xi32>
    %44 = vector.broadcast %33 : vector<1x1xi32> to vector<1x128xi32>
    %45 = arith.cmpi eq, %27, %44 : vector<1x128xi32>
    %c-2147483648_i32_10 = arith.constant -2147483648 : i32
    %46 = vector.broadcast %c-2147483648_i32_10 : i32 to vector<1x128xi32>
    %47 = arith.select %45, %46, %27 : vector<1x128xi1>, vector<1x128xi32>
    %cst_11 = arith.constant dense<-2147483648> : vector<1xi32>
    %48 = vector.multi_reduction <maxsi>, %47, %cst_11 [1] : vector<1x128xi32> to vector<1xi32>
    %49 = vector.shape_cast %48 : vector<1xi32> to vector<1x1xi32>
    %c1_i32 = arith.constant 1 : i32
    %50 = vector.broadcast %c1_i32 : i32 to vector<1x128xi32>
    %51 = arith.cmpi eq, %28, %50 : vector<1x128xi32>
    %52 = vector.shape_cast %49 : vector<1x1xi32> to vector<1x1xi32>
    %53 = vector.broadcast %52 : vector<1x1xi32> to vector<1x128xi32>
    %54 = arith.select %51, %53, %38 : vector<1x128xi1>, vector<1x128xi32>
    %c1_i32_12 = arith.constant 1 : i32
    %55 = vector.broadcast %c1_i32_12 : i32 to vector<16x1xi32>
    %56 = arith.cmpi eq, %29, %55 : vector<16x1xi32>
    %57 = vector.shape_cast %49 : vector<1x1xi32> to vector<1x1xi32>
    %58 = vector.broadcast %57 : vector<1x1xi32> to vector<16x1xi32>
    %59 = arith.select %56, %58, %43 : vector<16x1xi1>, vector<16x1xi32>
    %60 = vector.broadcast %49 : vector<1x1xi32> to vector<1x128xi32>
    %61 = arith.cmpi eq, %47, %60 : vector<1x128xi32>
    %c-2147483648_i32_13 = arith.constant -2147483648 : i32
    %62 = vector.broadcast %c-2147483648_i32_13 : i32 to vector<1x128xi32>
    %63 = arith.select %61, %62, %47 : vector<1x128xi1>, vector<1x128xi32>
    %cst_14 = arith.constant dense<-2147483648> : vector<1xi32>
    %64 = vector.multi_reduction <maxsi>, %63, %cst_14 [1] : vector<1x128xi32> to vector<1xi32>
    %65 = vector.shape_cast %64 : vector<1xi32> to vector<1x1xi32>
    %c2_i32 = arith.constant 2 : i32
    %66 = vector.broadcast %c2_i32 : i32 to vector<1x128xi32>
    %67 = arith.cmpi eq, %28, %66 : vector<1x128xi32>
    %68 = vector.shape_cast %65 : vector<1x1xi32> to vector<1x1xi32>
    %69 = vector.broadcast %68 : vector<1x1xi32> to vector<1x128xi32>
    %70 = arith.select %67, %69, %54 : vector<1x128xi1>, vector<1x128xi32>
    %c2_i32_15 = arith.constant 2 : i32
    %71 = vector.broadcast %c2_i32_15 : i32 to vector<16x1xi32>
    %72 = arith.cmpi eq, %29, %71 : vector<16x1xi32>
    %73 = vector.shape_cast %65 : vector<1x1xi32> to vector<1x1xi32>
    %74 = vector.broadcast %73 : vector<1x1xi32> to vector<16x1xi32>
    %75 = arith.select %72, %74, %59 : vector<16x1xi1>, vector<16x1xi32>
    %76 = vector.broadcast %65 : vector<1x1xi32> to vector<1x128xi32>
    %77 = arith.cmpi eq, %63, %76 : vector<1x128xi32>
    %c-2147483648_i32_16 = arith.constant -2147483648 : i32
    %78 = vector.broadcast %c-2147483648_i32_16 : i32 to vector<1x128xi32>
    %79 = arith.select %77, %78, %63 : vector<1x128xi1>, vector<1x128xi32>
    %cst_17 = arith.constant dense<-2147483648> : vector<1xi32>
    %80 = vector.multi_reduction <maxsi>, %79, %cst_17 [1] : vector<1x128xi32> to vector<1xi32>
    %81 = vector.shape_cast %80 : vector<1xi32> to vector<1x1xi32>
    %c3_i32 = arith.constant 3 : i32
    %82 = vector.broadcast %c3_i32 : i32 to vector<1x128xi32>
    %83 = arith.cmpi eq, %28, %82 : vector<1x128xi32>
    %84 = vector.shape_cast %81 : vector<1x1xi32> to vector<1x1xi32>
    %85 = vector.broadcast %84 : vector<1x1xi32> to vector<1x128xi32>
    %86 = arith.select %83, %85, %70 : vector<1x128xi1>, vector<1x128xi32>
    %c3_i32_18 = arith.constant 3 : i32
    %87 = vector.broadcast %c3_i32_18 : i32 to vector<16x1xi32>
    %88 = arith.cmpi eq, %29, %87 : vector<16x1xi32>
    %89 = vector.shape_cast %81 : vector<1x1xi32> to vector<1x1xi32>
    %90 = vector.broadcast %89 : vector<1x1xi32> to vector<16x1xi32>
    %91 = arith.select %88, %90, %75 : vector<16x1xi1>, vector<16x1xi32>
    %92 = vector.broadcast %81 : vector<1x1xi32> to vector<1x128xi32>
    %93 = arith.cmpi eq, %79, %92 : vector<1x128xi32>
    %c-2147483648_i32_19 = arith.constant -2147483648 : i32
    %94 = vector.broadcast %c-2147483648_i32_19 : i32 to vector<1x128xi32>
    %95 = arith.select %93, %94, %79 : vector<1x128xi1>, vector<1x128xi32>
    %cst_20 = arith.constant dense<-2147483648> : vector<1xi32>
    %96 = vector.multi_reduction <maxsi>, %95, %cst_20 [1] : vector<1x128xi32> to vector<1xi32>
    %97 = vector.shape_cast %96 : vector<1xi32> to vector<1x1xi32>
    %c4_i32 = arith.constant 4 : i32
    %98 = vector.broadcast %c4_i32 : i32 to vector<1x128xi32>
    %99 = arith.cmpi eq, %28, %98 : vector<1x128xi32>
    %100 = vector.shape_cast %97 : vector<1x1xi32> to vector<1x1xi32>
    %101 = vector.broadcast %100 : vector<1x1xi32> to vector<1x128xi32>
    %102 = arith.select %99, %101, %86 : vector<1x128xi1>, vector<1x128xi32>
    %c4_i32_21 = arith.constant 4 : i32
    %103 = vector.broadcast %c4_i32_21 : i32 to vector<16x1xi32>
    %104 = arith.cmpi eq, %29, %103 : vector<16x1xi32>
    %105 = vector.shape_cast %97 : vector<1x1xi32> to vector<1x1xi32>
    %106 = vector.broadcast %105 : vector<1x1xi32> to vector<16x1xi32>
    %107 = arith.select %104, %106, %91 : vector<16x1xi1>, vector<16x1xi32>
    %108 = vector.broadcast %97 : vector<1x1xi32> to vector<1x128xi32>
    %109 = arith.cmpi eq, %95, %108 : vector<1x128xi32>
    %c-2147483648_i32_22 = arith.constant -2147483648 : i32
    %110 = vector.broadcast %c-2147483648_i32_22 : i32 to vector<1x128xi32>
    %111 = arith.select %109, %110, %95 : vector<1x128xi1>, vector<1x128xi32>
    %cst_23 = arith.constant dense<-2147483648> : vector<1xi32>
    %112 = vector.multi_reduction <maxsi>, %111, %cst_23 [1] : vector<1x128xi32> to vector<1xi32>
    %113 = vector.shape_cast %112 : vector<1xi32> to vector<1x1xi32>
    %c5_i32 = arith.constant 5 : i32
    %114 = vector.broadcast %c5_i32 : i32 to vector<1x128xi32>
    %115 = arith.cmpi eq, %28, %114 : vector<1x128xi32>
    %116 = vector.shape_cast %113 : vector<1x1xi32> to vector<1x1xi32>
    %117 = vector.broadcast %116 : vector<1x1xi32> to vector<1x128xi32>
    %118 = arith.select %115, %117, %102 : vector<1x128xi1>, vector<1x128xi32>
    %c5_i32_24 = arith.constant 5 : i32
    %119 = vector.broadcast %c5_i32_24 : i32 to vector<16x1xi32>
    %120 = arith.cmpi eq, %29, %119 : vector<16x1xi32>
    %121 = vector.shape_cast %113 : vector<1x1xi32> to vector<1x1xi32>
    %122 = vector.broadcast %121 : vector<1x1xi32> to vector<16x1xi32>
    %123 = arith.select %120, %122, %107 : vector<16x1xi1>, vector<16x1xi32>
    %124 = vector.broadcast %113 : vector<1x1xi32> to vector<1x128xi32>
    %125 = arith.cmpi eq, %111, %124 : vector<1x128xi32>
    %c-2147483648_i32_25 = arith.constant -2147483648 : i32
    %126 = vector.broadcast %c-2147483648_i32_25 : i32 to vector<1x128xi32>
    %127 = arith.select %125, %126, %111 : vector<1x128xi1>, vector<1x128xi32>
    %cst_26 = arith.constant dense<-2147483648> : vector<1xi32>
    %128 = vector.multi_reduction <maxsi>, %127, %cst_26 [1] : vector<1x128xi32> to vector<1xi32>
    %129 = vector.shape_cast %128 : vector<1xi32> to vector<1x1xi32>
    %c6_i32 = arith.constant 6 : i32
    %130 = vector.broadcast %c6_i32 : i32 to vector<1x128xi32>
    %131 = arith.cmpi eq, %28, %130 : vector<1x128xi32>
    %132 = vector.shape_cast %129 : vector<1x1xi32> to vector<1x1xi32>
    %133 = vector.broadcast %132 : vector<1x1xi32> to vector<1x128xi32>
    %134 = arith.select %131, %133, %118 : vector<1x128xi1>, vector<1x128xi32>
    %c6_i32_27 = arith.constant 6 : i32
    %135 = vector.broadcast %c6_i32_27 : i32 to vector<16x1xi32>
    %136 = arith.cmpi eq, %29, %135 : vector<16x1xi32>
    %137 = vector.shape_cast %129 : vector<1x1xi32> to vector<1x1xi32>
    %138 = vector.broadcast %137 : vector<1x1xi32> to vector<16x1xi32>
    %139 = arith.select %136, %138, %123 : vector<16x1xi1>, vector<16x1xi32>
    %140 = vector.broadcast %129 : vector<1x1xi32> to vector<1x128xi32>
    %141 = arith.cmpi eq, %127, %140 : vector<1x128xi32>
    %c-2147483648_i32_28 = arith.constant -2147483648 : i32
    %142 = vector.broadcast %c-2147483648_i32_28 : i32 to vector<1x128xi32>
    %143 = arith.select %141, %142, %127 : vector<1x128xi1>, vector<1x128xi32>
    %cst_29 = arith.constant dense<-2147483648> : vector<1xi32>
    %144 = vector.multi_reduction <maxsi>, %143, %cst_29 [1] : vector<1x128xi32> to vector<1xi32>
    %145 = vector.shape_cast %144 : vector<1xi32> to vector<1x1xi32>
    %c7_i32 = arith.constant 7 : i32
    %146 = vector.broadcast %c7_i32 : i32 to vector<1x128xi32>
    %147 = arith.cmpi eq, %28, %146 : vector<1x128xi32>
    %148 = vector.shape_cast %145 : vector<1x1xi32> to vector<1x1xi32>
    %149 = vector.broadcast %148 : vector<1x1xi32> to vector<1x128xi32>
    %150 = arith.select %147, %149, %134 : vector<1x128xi1>, vector<1x128xi32>
    %c7_i32_30 = arith.constant 7 : i32
    %151 = vector.broadcast %c7_i32_30 : i32 to vector<16x1xi32>
    %152 = arith.cmpi eq, %29, %151 : vector<16x1xi32>
    %153 = vector.shape_cast %145 : vector<1x1xi32> to vector<1x1xi32>
    %154 = vector.broadcast %153 : vector<1x1xi32> to vector<16x1xi32>
    %155 = arith.select %152, %154, %139 : vector<16x1xi1>, vector<16x1xi32>
    %156 = vector.broadcast %145 : vector<1x1xi32> to vector<1x128xi32>
    %157 = arith.cmpi eq, %143, %156 : vector<1x128xi32>
    %c-2147483648_i32_31 = arith.constant -2147483648 : i32
    %158 = vector.broadcast %c-2147483648_i32_31 : i32 to vector<1x128xi32>
    %159 = arith.select %157, %158, %143 : vector<1x128xi1>, vector<1x128xi32>
    %cst_32 = arith.constant dense<-2147483648> : vector<1xi32>
    %160 = vector.multi_reduction <maxsi>, %159, %cst_32 [1] : vector<1x128xi32> to vector<1xi32>
    %161 = vector.shape_cast %160 : vector<1xi32> to vector<1x1xi32>
    %c8_i32 = arith.constant 8 : i32
    %162 = vector.broadcast %c8_i32 : i32 to vector<1x128xi32>
    %163 = arith.cmpi eq, %28, %162 : vector<1x128xi32>
    %164 = vector.shape_cast %161 : vector<1x1xi32> to vector<1x1xi32>
    %165 = vector.broadcast %164 : vector<1x1xi32> to vector<1x128xi32>
    %166 = arith.select %163, %165, %150 : vector<1x128xi1>, vector<1x128xi32>
    %c8_i32_33 = arith.constant 8 : i32
    %167 = vector.broadcast %c8_i32_33 : i32 to vector<16x1xi32>
    %168 = arith.cmpi eq, %29, %167 : vector<16x1xi32>
    %169 = vector.shape_cast %161 : vector<1x1xi32> to vector<1x1xi32>
    %170 = vector.broadcast %169 : vector<1x1xi32> to vector<16x1xi32>
    %171 = arith.select %168, %170, %155 : vector<16x1xi1>, vector<16x1xi32>
    %172 = vector.broadcast %161 : vector<1x1xi32> to vector<1x128xi32>
    %173 = arith.cmpi eq, %159, %172 : vector<1x128xi32>
    %c-2147483648_i32_34 = arith.constant -2147483648 : i32
    %174 = vector.broadcast %c-2147483648_i32_34 : i32 to vector<1x128xi32>
    %175 = arith.select %173, %174, %159 : vector<1x128xi1>, vector<1x128xi32>
    %cst_35 = arith.constant dense<-2147483648> : vector<1xi32>
    %176 = vector.multi_reduction <maxsi>, %175, %cst_35 [1] : vector<1x128xi32> to vector<1xi32>
    %177 = vector.shape_cast %176 : vector<1xi32> to vector<1x1xi32>
    %c9_i32 = arith.constant 9 : i32
    %178 = vector.broadcast %c9_i32 : i32 to vector<1x128xi32>
    %179 = arith.cmpi eq, %28, %178 : vector<1x128xi32>
    %180 = vector.shape_cast %177 : vector<1x1xi32> to vector<1x1xi32>
    %181 = vector.broadcast %180 : vector<1x1xi32> to vector<1x128xi32>
    %182 = arith.select %179, %181, %166 : vector<1x128xi1>, vector<1x128xi32>
    %c9_i32_36 = arith.constant 9 : i32
    %183 = vector.broadcast %c9_i32_36 : i32 to vector<16x1xi32>
    %184 = arith.cmpi eq, %29, %183 : vector<16x1xi32>
    %185 = vector.shape_cast %177 : vector<1x1xi32> to vector<1x1xi32>
    %186 = vector.broadcast %185 : vector<1x1xi32> to vector<16x1xi32>
    %187 = arith.select %184, %186, %171 : vector<16x1xi1>, vector<16x1xi32>
    %188 = vector.broadcast %177 : vector<1x1xi32> to vector<1x128xi32>
    %189 = arith.cmpi eq, %175, %188 : vector<1x128xi32>
    %c-2147483648_i32_37 = arith.constant -2147483648 : i32
    %190 = vector.broadcast %c-2147483648_i32_37 : i32 to vector<1x128xi32>
    %191 = arith.select %189, %190, %175 : vector<1x128xi1>, vector<1x128xi32>
    %cst_38 = arith.constant dense<-2147483648> : vector<1xi32>
    %192 = vector.multi_reduction <maxsi>, %191, %cst_38 [1] : vector<1x128xi32> to vector<1xi32>
    %193 = vector.shape_cast %192 : vector<1xi32> to vector<1x1xi32>
    %c10_i32 = arith.constant 10 : i32
    %194 = vector.broadcast %c10_i32 : i32 to vector<1x128xi32>
    %195 = arith.cmpi eq, %28, %194 : vector<1x128xi32>
    %196 = vector.shape_cast %193 : vector<1x1xi32> to vector<1x1xi32>
    %197 = vector.broadcast %196 : vector<1x1xi32> to vector<1x128xi32>
    %198 = arith.select %195, %197, %182 : vector<1x128xi1>, vector<1x128xi32>
    %c10_i32_39 = arith.constant 10 : i32
    %199 = vector.broadcast %c10_i32_39 : i32 to vector<16x1xi32>
    %200 = arith.cmpi eq, %29, %199 : vector<16x1xi32>
    %201 = vector.shape_cast %193 : vector<1x1xi32> to vector<1x1xi32>
    %202 = vector.broadcast %201 : vector<1x1xi32> to vector<16x1xi32>
    %203 = arith.select %200, %202, %187 : vector<16x1xi1>, vector<16x1xi32>
    %c-8192_i32_40 = arith.constant -8192 : i32
    %204 = vector.broadcast %c-8192_i32_40 : i32 to vector<1x128xi32>
    %205 = arith.andi %198, %204 : vector<1x128xi32>
    %c0_i32_41 = arith.constant 0 : i32
    %206 = vector.broadcast %c0_i32_41 : i32 to vector<1x128xi32>
    %207 = arith.cmpi slt, %205, %206 : vector<1x128xi32>
    %c8191_i32_42 = arith.constant 8191 : i32
    %208 = vector.broadcast %c8191_i32_42 : i32 to vector<1x128xi32>
    %209 = arith.ori %205, %208 : vector<1x128xi32>
    %c2147483647_i32_43 = arith.constant 2147483647 : i32
    %210 = vector.broadcast %c2147483647_i32_43 : i32 to vector<1x128xi32>
    %211 = arith.xori %209, %210 : vector<1x128xi32>
    %212 = arith.select %207, %211, %205 : vector<1x128xi1>, vector<1x128xi32>
    %213 = tpu.bitcast %212 : vector<1x128xi32> -> vector<1x128xf32>
    %c11_i32 = arith.constant 11 : i32
    %214 = vector.broadcast %c11_i32 : i32 to vector<1x128xi32>
    %215 = arith.cmpi slt, %28, %214 : vector<1x128xi32>
    %cst_44 = arith.constant 0.000000e+00 : f32
    %216 = vector.broadcast %cst_44 : f32 to vector<1x128xf32>
    %217 = arith.select %215, %213, %216 : vector<1x128xi1>, vector<1x128xf32>
    %c0_45 = arith.constant 0 : index
    %c0_46 = arith.constant 0 : index
    %c0_47 = arith.constant 0 : index
    %218 = vector.load %arg5[%c0_45, %c0_46, %c0_47] : memref<1x1x128xf32, #tpu.memory_space<vmem>>, vector<1x1x128xf32>
    %219 = vector.shape_cast %218 : vector<1x1x128xf32> to vector<1x128xf32>
    %220 = vector.shape_cast %217 : vector<1x128xf32> to vector<1x1x128xf32>
    tpu.vector_store %arg5[%c0_45, %c0_46, %c0_47], %220 {strides = array<i32>} : memref<1x1x128xf32, #tpu.memory_space<vmem>>, vector<1x1x128xf32>,
    %c8191_i32_48 = arith.constant 8191 : i32
    %221 = vector.broadcast %c8191_i32_48 : i32 to vector<16x1xi32>
    %222 = arith.andi %203, %221 : vector<16x1xi32>
    %c8191_i32_49 = arith.constant 8191 : i32
    %223 = vector.broadcast %c8191_i32_49 : i32 to vector<16x1xi32>
    %224 = arith.subi %223, %222 : vector<16x1xi32>
    %225 = tpu.iota {dimensions = array<i32: 1>} : vector<16x128xi32>
    %226 = vector.broadcast %224 : vector<16x1xi32> to vector<16x128xi32>
    %227 = arith.cmpi eq, %226, %225 : vector<16x128xi32>
    %228 = arith.extui %227 : vector<16x128xi1> to vector<16x128xi32>
    %229 = arith.sitofp %228 : vector<16x128xi32> to vector<16x128xf32>
    %230 = arith.truncf %229 : vector<16x128xf32> to vector<16x128xbf16>
    %231 = arith.sitofp %0 : vector<128x32xi32> to vector<128x32xbf16>
    %cst_50 = arith.constant dense<0.000000e+00> : vector<16x32xf32>
    %232 = tpu.matmul %230, %231, %cst_50 {dimension_numbers = #tpu.dot_dimension_numbers<[1], [0], [0], [1], [0, 0, 1, 1], [], []>} : vector<16x128xbf16>, vector<128x32xbf16>, vector<16x32xf32> -> vector<16x32xf32>
    %233 = arith.fptosi %232 : vector<16x32xf32> to vector<16x32xi32>
    %c0_51 = arith.constant 0 : index
    %c0_52 = arith.constant 0 : index
    %c0_53 = arith.constant 0 : index
    %234 = vector.load %arg4[%c0_51, %c0_52, %c0_53] : memref<1x16x32xi32, #tpu.memory_space<vmem>>, vector<1x16x32xi32>
    %235 = vector.shape_cast %234 : vector<1x16x32xi32> to vector<16x32xi32>
    %236 = vector.shape_cast %233 : vector<16x32xi32> to vector<1x16x32xi32>
    tpu.vector_store %arg4[%c0_51, %c0_52, %c0_53], %236 {strides = array<i32>} : memref<1x16x32xi32, #tpu.memory_space<vmem>>, vector<1x16x32xi32>,
    return
  }
  func.func @transform_0(%arg0: i32) -> (i32, i32, i32) {
    %c0_i32 = arith.constant 0 : i32
    %c0_i32_0 = arith.constant 0 : i32
    %c0_i32_1 = arith.constant 0 : i32
    return %arg0, %c0_i32, %c0_i32_0 : i32, i32, i32
  }
  func.func @transform_1(%arg0: i32) -> (i32, i32) {
    %c0_i32 = arith.constant 0 : i32
    %c0_i32_0 = arith.constant 0 : i32
    %c0_i32_1 = arith.constant 0 : i32
    return %c0_i32, %c0_i32_0 : i32, i32
  }
  func.func @transform_2(%arg0: i32) -> (i32, i32) {
    %c0_i32 = arith.constant 0 : i32
    %c0_i32_0 = arith.constant 0 : i32
    %c0_i32_1 = arith.constant 0 : i32
    return %c0_i32, %c0_i32_0 : i32, i32
  }
  func.func @transform_3(%arg0: i32) -> (i32, i32, i32) {
    %c0_i32 = arith.constant 0 : i32
    %c0_i32_0 = arith.constant 0 : i32
    %c0_i32_1 = arith.constant 0 : i32
    return %arg0, %c0_i32, %c0_i32_0 : i32, i32, i32
  }
  func.func @transform_4(%arg0: i32) -> (i32, i32, i32) {
    %c0_i32 = arith.constant 0 : i32
    %c0_i32_0 = arith.constant 0 : i32
    %c0_i32_1 = arith.constant 0 : i32
    return %arg0, %c0_i32, %c0_i32_0 : i32, i32, i32
  }
}

</mosaic_0001>

<bundles_post_ra>
// kernel: recommend_batch.1
= control target key start
LH: loop header
LB: loop body
LE: loop exit
PB: predicated region body
PF: predicated region fallthrough
CT: control target
= control target key end

     0   :  { %s1407_s15 = smov 0   ;;  %s1748_s0 = inlined_call_operand.vmem [shape: s32[4,1,32], index: 0, kind: input, shape index: {}]   ;;  %s1749_s1 = inlined_call_operand.vmem [shape: s32[128,32], index: 1, kind: input, shape index: {}]   ;;  %s1750_s2 = inlined_call_operand.vmem [shape: bf16[128,128], index: 2, kind: input, shape index: {}]   ;;  %s1751_s3 = inlined_call_operand.vmem [shape: s32[4,16,32], index: 3, kind: output, shape index: {0}]   ;;  %s1752_s4 = inlined_call_operand.vmem [shape: f32[4,1,128], index: 4, kind: output, shape index: {1}]  }
   0x1 LB: > { %s1233_s16 = sadd.s32 4294967295, %s1376_s15   ;;  %p1237_p0 = scmp.ge.s32.totalorder %s1376_s15, 1  ;;  %s1376_s15 = sphi %s1407_s15, %s15_s15  }
   0x2   : > { %p163_p1 = scmp.lt.s32.totalorder %s1376_s15, 5 }
   0x4   : > { %p164_p2 = pnand %p1237_p0, %p163_p1 }
   0x5   : > { %p190_p3 = scmp.lt.s32.totalorder (!%p164_p2), %s1233_s16, 3  ;;  %v204_v0 = vld [vmem:[%s1749_s1 + $0x10] sm:$0xff] (!%p164_p2)  ;;  %v202_v1 = vld [vmem:[%s1749_s1] sm:$0xff] (!%p164_p2)  ;;  %v205_v2 = vld [vmem:[%s1749_s1 + $0x18] sm:$0xff] (!%p164_p2)  ;;  %vm255_vm0 = vcmask (!%p164_p2), 261120   ;;  %v1378_v5 = vmov (!%p164_p2), 0  }
   0x6   : > { %167 = sbr.rel (%p164_p2) target bundleno = 3956 (0xf74), region = 32  ;;  %v203_v3 = vld [vmem:[%s1749_s1 + $0x8] sm:$0xff] (!%p164_p2)  ;;  %v206_v21 = vld [vmem:[%s1749_s1 + $0x20] sm:$0xff] (!%p164_p2)  ;;  %v209_v32 = vld [vmem:[%s1749_s1 + $0x38] sm:$0xff] (!%p164_p2) }
   0x7   : > { %v207_v20 = vld [vmem:[%s1749_s1 + $0x28] sm:$0xff] (!%p164_p2)  ;;  %v208_v33 = vld [vmem:[%s1749_s1 + $0x30] sm:$0xff] (!%p164_p2)  ;;  %v210_v47 = vld [vmem:[%s1749_s1 + $0x40] sm:$0xff] (!%p164_p2) }
   0x8   : > { %v211_v46 = vld [vmem:[%s1749_s1 + $0x48] sm:$0xff] (!%p164_p2)  ;;  %v213_v60 = vld [vmem:[%s1749_s1 + $0x58] sm:$0xff] (!%p164_p2)  ;;  %v212_v61 = vld [vmem:[%s1749_s1 + $0x50] sm:$0xff] (!%p164_p2) }
   0xd   : > { %s1754_s16 = smov (!%p190_p3, %s1233_s16), 3 }
   0xe   : > { %s192_s27 = scalar_lea.vmem %s1748_s0, %s1754_s16  ;;  %s200_s30 = scalar_lea.vmem %s1752_s4, %s1754_s16 }
   0xf   : > { %v1433_v4 = vld [vmem:[%s192_s27] ss:$0 sm:$0xff]  ;;  %s1271_s5 = sshll.u32 %s1754_s16, 4 }
  0x10   : > { %vm225_vm1 = vcmp.eq.s32.totalorder %v204_v0, %v1433_v4  ;;  %vm223_vm2 = vcmp.eq.s32.totalorder %v202_v1, %v1433_v4  ;;  %vm226_vm3 = vcmp.eq.s32.totalorder %v205_v2, %v1433_v4  ;;  %vm224_vm4 = vcmp.eq.s32.totalorder %v203_v3, %v1433_v4  ;;  %s197_s8 = scalar_lea.vmem %s1751_s3, %s1271_s5 }
  0x11   : > { %v241_v6 = vsel %vm225_vm1, 1, %v1378_v5  ;;  %v239_v7 = vsel %vm223_vm2, 1, %v1378_v5  ;;  %v242_v8 = vsel %vm226_vm3, 1, %v1378_v5  ;;  %v240_v9 = vsel %vm224_vm4, 1, %v1378_v5 }
  0x12   : > { %v282_v10 = vsel %vm255_vm0, %v241_v6, 0  ;;  %v256_v11 = vsel %vm255_vm0, %v239_v7, 0  ;;  %v295_v12 = vsel %vm255_vm0, %v242_v8, 0  ;;  %v269_v13 = vsel %vm255_vm0, %v240_v9, 0 }
  0x13   : > { %v284_v14 = vshrl.u32 %v282_v10, 16  ;;  %v258_v15 = vshrl.u32 %v256_v11, 16  ;;  %v297_v16 = vshrl.u32 %v295_v12, 16  ;;  %v271_v17 = vshrl.u32 %v269_v13, 16 }
  0x14   : > { %v270_v18 = vand.u32 65535, %v269_v13  ;;  %v257_v19 = vand.u32 65535, %v256_v11  ;;  %vm228_vm5 = vcmp.eq.s32.totalorder %v207_v20, %v1433_v4  ;;  %vm227_vm6 = vcmp.eq.s32.totalorder %v206_v21, %v1433_v4  ;;  %v215_v13 = vld [vmem:[%s1749_s1 + $0x68] sm:$0xff] }
  0x15   : > { %v286_v22 = vcvt.s32.f32 %v284_v14  ;;  %v260_v23 = vcvt.s32.f32 %v258_v15  ;;  %v299_v24 = vcvt.s32.f32 %v297_v16  ;;  %v273_v25 = vcvt.s32.f32 %v271_v17  ;;  %v214_v14 = vld [vmem:[%s1749_s1 + $0x60] sm:$0xff] }
  0x16   : > { %v244_v26 = vsel %vm228_vm5, 1, %v1378_v5  ;;  %v243_v27 = vsel %vm227_vm6, 1, %v1378_v5  ;;  %v272_v28 = vcvt.s32.f32 %v270_v18  ;;  %v259_v29 = vcvt.s32.f32 %v257_v19 }
  0x17   : > { %289 = vadd.xlane.f32.xlu1 %v286_v22  ;;  %263 = vadd.xlane.f32.xlu0 %v260_v23  ;;  %v296_v30 = vand.u32 65535, %v295_v12  ;;  %v283_v31 = vand.u32 65535, %v282_v10  ;;  %v321_v34 = vsel %vm255_vm0, %v244_v26, 0  ;;  %v308_v35 = vsel %vm255_vm0, %v243_v27, 0  ;;  %v217_v27 = vld [vmem:[%s1749_s1 + $0x78] sm:$0xff] }
  0x18   : > { %vm230_vm7 = vcmp.eq.s32.totalorder %v209_v32, %v1433_v4  ;;  %vm229_vm8 = vcmp.eq.s32.totalorder %v208_v33, %v1433_v4  ;;  %v323_v38 = vshrl.u32 %v321_v34, 16  ;;  %v310_v39 = vshrl.u32 %v308_v35, 16 }
  0x19   : > { %v298_v36 = vcvt.s32.f32 %v296_v30  ;;  %v285_v37 = vcvt.s32.f32 %v283_v31  ;;  %v246_v40 = vsel %vm230_vm7, 1, %v1378_v5  ;;  %v245_v41 = vsel %vm229_vm8, 1, %v1378_v5 }
  0x1a   : > { %v325_v42 = vcvt.s32.f32 %v323_v38  ;;  %v312_v43 = vcvt.s32.f32 %v310_v39  ;;  %v322_v44 = vand.u32 65535, %v321_v34  ;;  %v309_v45 = vand.u32 65535, %v308_v35 }
  0x1b   : > { %302 = vadd.xlane.f32.xlu1 %v299_v24  ;;  %276 = vadd.xlane.f32.xlu0 %v273_v25  ;;  %v347_v48 = vsel %vm255_vm0, %v246_v40, 0  ;;  %v334_v49 = vsel %vm255_vm0, %v245_v41, 0  ;;  %vm232_vm9 = vcmp.eq.s32.totalorder %v211_v46, %v1433_v4  ;;  %vm231_vm10 = vcmp.eq.s32.totalorder %v210_v47, %v1433_v4 }
  0x1c   : > { %v324_v50 = vcvt.s32.f32 %v322_v44  ;;  %v311_v51 = vcvt.s32.f32 %v309_v45  ;;  %v349_v52 = vshrl.u32 %v347_v48, 16  ;;  %v336_v53 = vshrl.u32 %v334_v49, 16 }
  0x1d   : > { %v248_v54 = vsel %vm232_vm9, 1, %v1378_v5  ;;  %v247_v55 = vsel %vm231_vm10, 1, %v1378_v5  ;;  %v348_v56 = vand.u32 65535, %v347_v48  ;;  %v335_v59 = vand.u32 65535, %v334_v49 }
  0x1e   : > { %v351_v57 = vcvt.s32.f32 %v349_v52  ;;  %v338_v58 = vcvt.s32.f32 %v336_v53  ;;  %v373_v62 = vsel %vm255_vm0, %v248_v54, 0  ;;  %v360_v63 = vsel %vm255_vm0, %v247_v55, 0  ;;  %v1347_v52 = vld [vmem:[%s1750_s2 + $0x8] sm:$0xff]   ;;  %v1348_v53 = vld [vmem:[%s1750_s2 + $0x10] sm:$0xff]   ;;  %v1349_v54 = vld [vmem:[%s1750_s2 + $0x18] sm:$0xff]  }
  0x1f   : > { %274 = vadd.xlane.f32.xlu1 %v272_v28  ;;  %261 = vadd.xlane.f32.xlu0 %v259_v29  ;;  %v1379_v0 = vmov 0.0   ;;  %vm234_vm11 = vcmp.eq.s32.totalorder %v213_v60, %v1433_v4  ;;  %vm233_vm12 = vcmp.eq.s32.totalorder %v212_v61, %v1433_v4  ;;  %v350_v1 = vcvt.s32.f32 %v348_v56  ;;  %v216_v28 = vld [vmem:[%s1749_s1 + $0x70] sm:$0xff]  ;;  %v1350_v55 = vld [vmem:[%s1750_s2 + $0x20] sm:$0xff]   ;;  %v1351_v56 = vld [vmem:[%s1750_s2 + $0x28] sm:$0xff]  }
  0x20   : > { %1290 = vmatprep.subr.bf16.mxu0 %v1379_v0  ;;  %1310 = vmatprep.subr.bf16.mxu1 %v1379_v0  ;;  %v337_v2 = vcvt.s32.f32 %v335_v59  ;;  %v375_v3 = vshrl.u32 %v373_v62, 16  ;;  %v362_v6 = vshrl.u32 %v360_v63, 16  ;;  %v250_v7 = vsel %vm234_vm11, 1, %v1378_v5 }
  0x21   : > { %v249_v8 = vsel %vm233_vm12, 1, %v1378_v5  ;;  %v374_v11 = vand.u32 65535, %v373_v62  ;;  %v361_v12 = vand.u32 65535, %v360_v63  ;;  %v399_v15 = vsel %vm255_vm0, %v250_v7, 0 }
  0x22   : > { %v377_v9 = vcvt.s32.f32 %v375_v3  ;;  %v364_v10 = vcvt.s32.f32 %v362_v6  ;;  %v386_v16 = vsel %vm255_vm0, %v249_v8, 0  ;;  %vm236_vm13 = vcmp.eq.s32.totalorder %v215_v13, %v1433_v4 }
  0x23   : > { %300 = vadd.xlane.f32.xlu1 %v298_v36  ;;  %287 = vadd.xlane.f32.xlu0 %v285_v37  ;;  %vm235_vm14 = vcmp.eq.s32.totalorder %v214_v14, %v1433_v4  ;;  %v376_v17 = vcvt.s32.f32 %v374_v11  ;;  %v363_v18 = vcvt.s32.f32 %v361_v12  ;;  %v401_v19 = vshrl.u32 %v399_v15, 16 }
  0x24   : > { %v388_v20 = vshrl.u32 %v386_v16, 16  ;;  %v252_v21 = vsel %vm236_vm13, 1, %v1378_v5  ;;  %v251_v22 = vsel %vm235_vm14, 1, %v1378_v5  ;;  %v400_v25 = vand.u32 65535, %v399_v15 }
  0x25   : > { %v403_v23 = vcvt.s32.f32 %v401_v19  ;;  %v387_v26 = vand.u32 65535, %v386_v16  ;;  %v425_v29 = vsel %vm255_vm0, %v252_v21, 0  ;;  %v412_v30 = vsel %vm255_vm0, %v251_v22, 0 }
  0x26   : > { %v390_v24 = vcvt.s32.f32 %v388_v20  ;;  %vm238_vm15 = vcmp.eq.s32.totalorder %v217_v27, %v1433_v4  ;;  %vm237_vm1 = vcmp.eq.s32.totalorder %v216_v28, %v1433_v4  ;;  %v402_v31 = vcvt.s32.f32 %v400_v25 }
  0x27   : > { %328 = vadd.xlane.f32.xlu1 %v325_v42  ;;  %315 = vadd.xlane.f32.xlu0 %v312_v43  ;;  %v389_v32 = vcvt.s32.f32 %v387_v26  ;;  %v427_v33 = vshrl.u32 %v425_v29, 16  ;;  %v414_v34 = vshrl.u32 %v412_v30, 16  ;;  %v254_v35 = vsel %vm238_vm15, 1, %v1378_v5 }
  0x28   : > { %v253_v36 = vsel %vm237_vm1, 1, %v1378_v5  ;;  %v426_v39 = vand.u32 65535, %v425_v29  ;;  %v413_v40 = vand.u32 65535, %v412_v30  ;;  %v451_v41 = vsel %vm255_vm0, %v254_v35, 0 }
  0x29   : > { %v429_v37 = vcvt.s32.f32 %v427_v33  ;;  %v416_v38 = vcvt.s32.f32 %v414_v34  ;;  %v438_v4 = vsel %vm255_vm0, %v253_v36, 0  ;;  %v453_v44 = vshrl.u32 %v451_v41, 16 }
  0x2a   : > { %v428_v42 = vcvt.s32.f32 %v426_v39  ;;  %v415_v43 = vcvt.s32.f32 %v413_v40  ;;  %v440_v45 = vshrl.u32 %v438_v4, 16  ;;  %v452_v47 = vand.u32 65535, %v451_v41 }
  0x2b   : > { %326 = vadd.xlane.f32.xlu1 %v324_v50  ;;  %313 = vadd.xlane.f32.xlu0 %v311_v51  ;;  %v455_v46 = vcvt.s32.f32 %v453_v44  ;;  %v439_v48 = vand.u32 65535, %v438_v4  ;;  %v1346_v51 = vld [vmem:[%s1750_s2] sm:$0xff]   ;;  %vm1380_vm2 = vmmov 0   ;;  %vm571_vm7 = vcmask 130112  }
  0x2c   : > { %v442_v5 = vcvt.s32.f32 %v440_v45  ;;  %v454_v49 = vcvt.s32.f32 %v452_v47  ;;  %1291 = vmatpush3.bf16.msra.mxu0 %v1346_v51  ;;  %1306 = vmatprep.mubr.msk.bf16.mxu0 %vm1380_vm2, %v1379_v0  ;;  %vm578_vm10 = vcmask 195712   ;;  %vm585_vm13 = vcmask 261312  }
  0x2d   : > { %v441_v50 = vcvt.s32.f32 %v439_v48  ;;  %1292 = vmatprep.subr.bf16.mxu0 %v1379_v0  ;;  %1326 = vmatprep.mubr.msk.bf16.mxu1 %vm1380_vm2, %v1379_v0  ;;  %vm592_vm14 = vcmask 326912   ;;  %vm599_vm2 = vcmask 392512  }
  0x2f   : > { %354 = vadd.xlane.f32.xlu1 %v351_v57  ;;  %341 = vadd.xlane.f32.xlu0 %v338_v58  ;;  %v1352_v57 = vld [vmem:[%s1750_s2 + $0x30] sm:$0xff]   ;;  %v1353_v58 = vld [vmem:[%s1750_s2 + $0x38] sm:$0xff]  }
  0x30   : > { %1293 = vmatpush3.bf16.msra.mxu0 %v1347_v52 }
  0x31   : > { %1294 = vmatprep.subr.bf16.mxu0 %v1379_v0 }
  0x33   : > { %352 = vadd.xlane.f32.xlu1 %v350_v1  ;;  %339 = vadd.xlane.f32.xlu0 %v337_v2 }
  0x34   : > { %1295 = vmatpush3.bf16.msra.mxu0 %v1348_v53 }
  0x35   : > { %1296 = vmatprep.subr.bf16.mxu0 %v1379_v0 }
  0x37   : > { %380 = vadd.xlane.f32.xlu1 %v377_v9  ;;  %367 = vadd.xlane.f32.xlu0 %v364_v10 }
  0x38   : > { %1297 = vmatpush3.bf16.msra.mxu0 %v1349_v54 }
  0x39   : > { %1298 = vmatprep.subr.bf16.mxu0 %v1379_v0 }
  0x3b   : > { %378 = vadd.xlane.f32.xlu1 %v376_v17  ;;  %365 = vadd.xlane.f32.xlu0 %v363_v18 }
  0x3c   : > { %1299 = vmatpush3.bf16.msra.mxu0 %v1350_v55 }
  0x3d   : > { %1300 = vmatprep.subr.bf16.mxu0 %v1379_v0 }
  0x3f   : > { %406 = vadd.xlane.f32.xlu1 %v403_v23  ;;  %393 = vadd.xlane.f32.xlu0 %v390_v24  ;;  %v560_v24 = vlaneseq }
  0x40   : > { %1301 = vmatpush3.bf16.msra.mxu0 %v1351_v56 }
  0x41   : > { %1302 = vmatprep.subr.bf16.mxu0 %v1379_v0  ;;  %v1554_v33 = vand.u32 127, %v560_v24  ;;  %v1558_v39 = vshrl.u32 %v560_v24, 7 }
  0x43   : > { %404 = vadd.xlane.f32.xlu1 %v402_v31  ;;  %391 = vadd.xlane.f32.xlu0 %v389_v32  ;;  %v566_v45 = vadd.s32 4294967288, %v1554_v33  ;;  %v564_v52 = vsub.s32 %v1554_v33, %v1558_v39 }
  0x44   : > { %1303 = vmatpush3.bf16.msra.mxu0 %v1352_v57 }
  0x45   : > { %1304 = vmatprep.subr.bf16.mxu0 %v1379_v0 }
  0x47   : > { %432 = vadd.xlane.f32.xlu1 %v429_v37  ;;  %419 = vadd.xlane.f32.xlu0 %v416_v38 }
  0x48   : > { %1305 = vmatpush3.bf16.msra.mxu0 %v1353_v58 }
  0x4b   : > { %430 = vadd.xlane.f32.xlu1 %v428_v42  ;;  %417 = vadd.xlane.f32.xlu0 %v415_v43 }
  0x4f   : > { %458 = vadd.xlane.f32.xlu1 %v455_v46  ;;  %445 = vadd.xlane.f32.xlu0 %v442_v5 }
  0x53   : > { %456 = vadd.xlane.f32.xlu1 %v454_v49  ;;  %443 = vadd.xlane.f32.xlu0 %v441_v50  ;;  %v573_v49 = vadd.s32 4294967280, %v1554_v33  ;;  %v580_v50 = vadd.s32 4294967272, %v1554_v33 }
  0xa4   : > { %v290_v59 = vpop.xlane.xlu1 %289  ;;  %v264_v60 = vpop.xlane.xlu0 %263 }
  0xa5   : > { %v266_v6 = vcvt.f32.s32 %v264_v60  ;;  %v292_v12 = vcvt.f32.s32 %v290_v59  ;;  %v569_v59 = vsub.s32 %v566_v45, %v1558_v39 }
  0xa7   : > { %v267_v13 = vshll.u32 %v266_v6, 16  ;;  %v293_v22 = vshll.u32 %v292_v12, 16  ;;  %v587_v6 = vadd.s32 4294967264, %v1554_v33 }
  0xa8   : > { %v303_v61 = vpop.xlane.xlu1 %302  ;;  %v277_v62 = vpop.xlane.xlu0 %276 }
  0xa9   : > { %v279_v7 = vcvt.f32.s32 %v277_v62  ;;  %v305_v14 = vcvt.f32.s32 %v303_v61 }
  0xab   : > { %v280_v15 = vshll.u32 %v279_v7, 16  ;;  %v306_v23 = vshll.u32 %v305_v14, 16 }
  0xac   : > { %v275_v63 = vpop.xlane.xlu1 %274  ;;  %v262_v1 = vpop.xlane.xlu0 %261 }
  0xad   : > { %v278_v8 = vcvt.f32.s32 %v275_v63  ;;  %v265_v9 = vcvt.f32.s32 %v262_v1  ;;  %v576_v1 = vsub.s32 %v573_v49, %v1558_v39  ;;  %v615_v49 = vadd.s32 4294967232, %v1554_v33 }
  0xaf   : > { %v281_v16 = vadd.s32 %v280_v15, %v278_v8  ;;  %v268_v17 = vadd.s32 %v267_v13, %v265_v9 }
  0xb0   : > { %v301_v2 = vpop.xlane.xlu1 %300  ;;  %v288_v3 = vpop.xlane.xlu0 %287 }
  0xb1   : > { %v304_v18 = vcvt.f32.s32 %v301_v2  ;;  %v291_v19 = vcvt.f32.s32 %v288_v3  ;;  %vm465_vm3 = vcmp.eq.s32.totalorder %v281_v16, 32  ;;  %vm464_vm4 = vcmp.eq.s32.totalorder %v268_v17, 32 }
  0xb2   : > { %v1242_v35 = vsel %vm465_vm3, 1.0, %v1379_v0  ;;  %v1241_v36 = vsel %vm464_vm4, 1.0, %v1379_v0  ;;  %v583_v2 = vsub.s32 %v580_v50, %v1558_v39  ;;  %v594_v16 = vadd.s32 4294967256, %v1554_v33 }
  0xb3   : > { %v307_v27 = vadd.s32 %v306_v23, %v304_v18  ;;  %v294_v28 = vadd.s32 %v293_v22, %v291_v19  ;;  %v512_v46 = vpack.c.bf16 %v1242_v35, %v1241_v36  ;;  %v608_v35 = vadd.s32 4294967240, %v1554_v33 }
  0xb4   : > { %v329_v10 = vpop.xlane.xlu1 %328  ;;  %v316_v11 = vpop.xlane.xlu0 %315  ;;  %vm606_vm3 = vcmask 458112   ;;  %vm613_vm4 = vcmask 523712  }
  0xb5   : > { %v331_v25 = vcvt.f32.s32 %v329_v10  ;;  %v318_v26 = vcvt.f32.s32 %v316_v11  ;;  %vm467_vm5 = vcmp.eq.s32.totalorder %v307_v27, 32  ;;  %vm466_vm6 = vcmp.eq.s32.totalorder %v294_v28, 32 }
  0xb6   : > { %v1244_v48 = vsel %vm467_vm5, 1.0, %v1379_v0  ;;  %v1243_v51 = vsel %vm466_vm6, 1.0, %v1379_v0  ;;  %v544_v60 = vunpack.c.l.b16 %v512_v46  ;;  %v545_v63 = vunpack.c.h.b16 %v512_v46 }
  0xb7   : > { %v332_v37 = vshll.u32 %v331_v25, 16  ;;  %v319_v38 = vshll.u32 %v318_v26, 16  ;;  %v513_v61 = vpack.c.bf16 %v1244_v48, %v1243_v51  ;;  %v590_v28 = vsub.s32 %v587_v6, %v1558_v39 }
  0xb8   : > { %v327_v20 = vpop.xlane.xlu1 %326  ;;  %v314_v21 = vpop.xlane.xlu0 %313  ;;  %v565_v14 = vrot.slane %v544_v60, %v564_v52  ;;  %v570_v17 = vrot.slane %v545_v63, %v569_v59  ;;  %v611_v52 = vsub.s32 %v608_v35, %v1558_v39  ;;  %vm620_vm5 = vcmask 589312  }
  0xb9   : > { %v330_v31 = vcvt.f32.s32 %v327_v20  ;;  %v317_v32 = vcvt.f32.s32 %v314_v21  ;;  %v546_v15 = vunpack.c.l.b16 %v513_v61  ;;  %v547_v21 = vunpack.c.h.b16 %v513_v61 }
  0xba   : > { %v629_v6 = vadd.s32 4294967216, %v1554_v33 }
  0xbb   : > { %v333_v42 = vadd.s32 %v332_v37, %v330_v31  ;;  %v320_v43 = vadd.s32 %v319_v38, %v317_v32  ;;  %v577_v27 = vrot.slane %v546_v15, %v576_v1  ;;  %v572_v31 = vsel %vm571_vm7, %v570_v17, %v565_v14 }
  0xbc   : > { %v355_v29 = vpop.xlane.xlu1 %354  ;;  %v342_v30 = vpop.xlane.xlu0 %341  ;;  %v597_v32 = vsub.s32 %v594_v16, %v1558_v39  ;;  %v584_v36 = vrot.slane %v547_v21, %v583_v2 }
  0xbd   : > { %v357_v34 = vcvt.f32.s32 %v355_v29  ;;  %v344_v40 = vcvt.f32.s32 %v342_v30  ;;  %vm469_vm8 = vcmp.eq.s32.totalorder %v333_v42, 32  ;;  %vm468_vm9 = vcmp.eq.s32.totalorder %v320_v43, 32 }
  0xbe   : > { %v1246_v3 = vsel %vm469_vm8, 1.0, %v1379_v0  ;;  %v1245_v7 = vsel %vm468_vm9, 1.0, %v1379_v0  ;;  %v601_v29 = vadd.s32 4294967248, %v1554_v33  ;;  %v579_v46 = vsel %vm578_vm10, %v577_v27, %v572_v31 }
  0xbf   : > { %v358_v5 = vshll.u32 %v357_v34, 16  ;;  %v345_v53 = vshll.u32 %v344_v40, 16  ;;  %v514_v18 = vpack.c.bf16 %v1246_v3, %v1245_v7  ;;  %v618_v3 = vsub.s32 %v615_v49, %v1558_v39 }
  0xc0   : > { %v353_v41 = vpop.xlane.xlu1 %352  ;;  %v340_v4 = vpop.xlane.xlu0 %339  ;;  %vm627_vm8 = vcmask 654912  }
  0xc1   : > { %v356_v44 = vcvt.f32.s32 %v353_v41  ;;  %v343_v47 = vcvt.f32.s32 %v340_v4  ;;  %v548_v34 = vunpack.c.l.b16 %v514_v18 }
  0xc3   : > { %v359_v54 = vadd.s32 %v358_v5, %v356_v44  ;;  %v346_v62 = vadd.s32 %v345_v53, %v343_v47  ;;  %v549_v5 = vunpack.c.h.b16 %v514_v18  ;;  %v604_v47 = vsub.s32 %v601_v29, %v1558_v39 }
  0xc4   : > { %v381_v55 = vpop.xlane.xlu1 %380  ;;  %v368_v56 = vpop.xlane.xlu0 %367  ;;  %v591_v48 = vrot.slane %v548_v34, %v590_v28  ;;  %v650_v34 = vadd.s32 4294967192, %v1554_v33 }
  0xc5   : > { %v383_v57 = vcvt.f32.s32 %v381_v55  ;;  %v370_v58 = vcvt.f32.s32 %v368_v56  ;;  %vm471_vm11 = vcmp.eq.s32.totalorder %v359_v54, 32  ;;  %vm470_vm12 = vcmp.eq.s32.totalorder %v346_v62, 32 }
  0xc6   : > { %v1248_v22 = vsel %vm471_vm11, 1.0, %v1379_v0  ;;  %v1247_v25 = vsel %vm470_vm12, 1.0, %v1379_v0  ;;  %v622_v54 = vadd.s32 4294967224, %v1554_v33  ;;  %v598_v60 = vrot.slane %v549_v5, %v597_v32 }
  0xc7   : > { %v384_v10 = vshll.u32 %v383_v57, 16  ;;  %v371_v11 = vshll.u32 %v370_v58, 16  ;;  %v515_v37 = vpack.c.bf16 %v1248_v22, %v1247_v25  ;;  %v586_v58 = vsel %vm585_vm13, %v584_v36, %v579_v46 }
  0xc8   : > { %v379_v8 = vpop.xlane.xlu1 %378  ;;  %v366_v9 = vpop.xlane.xlu0 %365  ;;  %v593_v1 = vsel %vm592_vm14, %v591_v48, %v586_v58  ;;  %v625_v18 = vsub.s32 %v622_v54, %v1558_v39  ;;  %vm634_vm11 = vcmask 720512   ;;  %vm641_vm12 = vcmask 786112  }
  0xc9   : > { %v382_v12 = vcvt.f32.s32 %v379_v8  ;;  %v369_v13 = vcvt.f32.s32 %v366_v9  ;;  %v550_v53 = vunpack.c.l.b16 %v515_v37  ;;  %v551_v2 = vunpack.c.h.b16 %v515_v37 }
  0xca   : > { %v636_v9 = vadd.s32 4294967208, %v1554_v33  ;;  %v600_v17 = vsel %vm599_vm2, %v598_v60, %v593_v1  ;;  %vm662_vm2 = vcmask 982912  }
  0xcb   : > { %v385_v19 = vadd.s32 %v384_v10, %v382_v12  ;;  %v372_v20 = vadd.s32 %v371_v11, %v369_v13  ;;  %v605_v7 = vrot.slane %v550_v53, %v604_v47  ;;  %v664_v53 = vadd.s32 4294967176, %v1554_v33 }
  0xcc   : > { %v407_v23 = vpop.xlane.xlu1 %406  ;;  %v394_v24 = vpop.xlane.xlu0 %393 }
  0xcd   : > { %vm473_vm15 = vcmp.eq.s32.totalorder %v385_v19, 32  ;;  %vm472_vm1 = vcmp.eq.s32.totalorder %v372_v20, 32  ;;  %v409_v26 = vcvt.f32.s32 %v407_v23  ;;  %v396_v30 = vcvt.f32.s32 %v394_v24 }
  0xce   : > { %v1250_v38 = vsel %vm473_vm15, 1.0, %v1379_v0  ;;  %v1249_v40 = vsel %vm472_vm1, 1.0, %v1379_v0  ;;  %v643_v19 = vadd.s32 4294967200, %v1554_v33  ;;  %v612_v20 = vrot.slane %v551_v2, %v611_v52 }
  0xcf   : > { %v410_v42 = vshll.u32 %v409_v26, 16  ;;  %v397_v43 = vshll.u32 %v396_v30, 16  ;;  %v516_v55 = vpack.c.bf16 %v1250_v38, %v1249_v40  ;;  %v607_v24 = vsel %vm606_vm3, %v605_v7, %v600_v17 }
  0xd0   : > { %v405_v41 = vpop.xlane.xlu1 %404  ;;  %v392_v4 = vpop.xlane.xlu0 %391  ;;  %v632_v26 = vsub.s32 %v629_v6, %v1558_v39  ;;  %v639_v30 = vsub.s32 %v636_v9, %v1558_v39  ;;  %v614_v37 = vsel %vm613_vm4, %v612_v20, %v607_v24  ;;  %v646_v40 = vsub.s32 %v643_v19, %v1558_v39 }
  0xd1   : > { %v408_v44 = vcvt.f32.s32 %v405_v41  ;;  %v395_v45 = vcvt.f32.s32 %v392_v4  ;;  %v552_v8 = vunpack.c.l.b16 %v516_v55  ;;  %v553_v21 = vunpack.c.h.b16 %v516_v55 }
  0xd2   : > { %vm648_vm15 = vcmask 851712   ;;  %v667_v1 = vsub.s32 %v664_v53, %v1558_v39  ;;  %vm655_vm1 = vcmask 917312   ;;  %vm669_vm3 = vcmask 1048512  }
  0xd3   : > { %v411_v50 = vadd.s32 %v410_v42, %v408_v44  ;;  %v398_v51 = vadd.s32 %v397_v43, %v395_v45  ;;  %v619_v25 = vrot.slane %v552_v8, %v618_v3  ;;  %v626_v38 = vrot.slane %v553_v21, %v625_v18 }
  0xd4   : > { %v433_v56 = vpop.xlane.xlu1 %432  ;;  %v420_v57 = vpop.xlane.xlu0 %419  ;;  %vm771_vm4 = vcmask 1040384  }
  0xd5   : > { %vm475_vm6 = vcmp.eq.s32.totalorder %v411_v50, 32  ;;  %vm474_vm7 = vcmp.eq.s32.totalorder %v398_v51, 32  ;;  %v435_v59 = vcvt.f32.s32 %v433_v56  ;;  %v422_v63 = vcvt.f32.s32 %v420_v57 }
  0xd6   : > { %v1252_v61 = vsel %vm475_vm6, 1.0, %v1379_v0  ;;  %v1251_v62 = vsel %vm474_vm7, 1.0, %v1379_v0  ;;  %v621_v4 = vsel %vm620_vm5, %v619_v25, %v614_v37  ;;  %v657_v51 = vadd.s32 4294967184, %v1554_v33 }
  0xd7   : > { %v517_v10 = vpack.c.bf16 %v1252_v61, %v1251_v62  ;;  %v436_v13 = vshll.u32 %v435_v59, 16  ;;  %v423_v14 = vshll.u32 %v422_v63, 16  ;;  %v628_v54 = vsel %vm627_vm8, %v626_v38, %v621_v4 }
  0xd8   : > { %v431_v11 = vpop.xlane.xlu1 %430  ;;  %v418_v12 = vpop.xlane.xlu0 %417  ;;  %v653_v56 = vsub.s32 %v650_v34, %v1558_v39  ;;  %v660_v62 = vsub.s32 %v657_v51, %v1558_v39  ;;  %vm787_vm8 = vcmp.eq.s32.totalorder %v1554_v33, 0 }
  0xd9   : > { %v434_v15 = vcvt.f32.s32 %v431_v11  ;;  %v421_v16 = vcvt.f32.s32 %v418_v12  ;;  %v554_v27 = vunpack.c.l.b16 %v517_v10  ;;  %v555_v42 = vunpack.c.h.b16 %v517_v10 }
  0xdb   : > { %v437_v22 = vadd.s32 %v436_v13, %v434_v15  ;;  %v424_v23 = vadd.s32 %v423_v14, %v421_v16  ;;  %v633_v43 = vrot.slane %v554_v27, %v632_v26  ;;  %v640_v55 = vrot.slane %v555_v42, %v639_v30 }
  0xdc   : > { %v459_v28 = vpop.xlane.xlu1 %458  ;;  %v446_v29 = vpop.xlane.xlu0 %445 }
  0xdd   : > { %vm477_vm9 = vcmp.eq.s32.totalorder %v437_v22, 32  ;;  %vm476_vm10 = vcmp.eq.s32.totalorder %v424_v23, 32  ;;  %v461_v31 = vcvt.f32.s32 %v459_v28  ;;  %v448_v36 = vcvt.f32.s32 %v446_v29 }
  0xde   : > { %v1254_v32 = vsel %vm477_vm9, 1.0, %v1379_v0  ;;  %v1253_v35 = vsel %vm476_vm10, 1.0, %v1379_v0  ;;  %v635_v58 = vsel %vm634_vm11, %v633_v43, %v628_v54  ;;  %v766_v22 = vsub.s32 8191, %v1554_v33 }
  0xdf   : > { %v518_v41 = vpack.c.bf16 %v1254_v32, %v1253_v35  ;;  %v462_v44 = vshll.u32 %v461_v31, 16  ;;  %v449_v47 = vshll.u32 %v448_v36, 16  ;;  %v642_v3 = vsel %vm641_vm12, %v640_v55, %v635_v58 }
  0xe0   : > { %v457_v45 = vpop.xlane.xlu1 %456  ;;  %v444_v46 = vpop.xlane.xlu0 %443  ;;  %vm814_vm9 = vcmp.eq.s32.totalorder %v1554_v33, 1  ;;  %vm789_vm10 = vcmp.eq.s32.totalorder %v1558_v39, 0  ;;  %vm816_vm11 = vcmp.eq.s32.totalorder %v1558_v39, 1 }
  0xe1   : > { %v556_v5 = vunpack.c.l.b16 %v518_v41  ;;  %v460_v48 = vcvt.f32.s32 %v457_v45  ;;  %v447_v49 = vcvt.f32.s32 %v444_v46  ;;  %v557_v57 = vunpack.c.h.b16 %v518_v41 }
  0xe3   : > { %v463_v50 = vadd.s32 %v462_v44, %v460_v48  ;;  %v450_v52 = vadd.s32 %v449_v47, %v447_v49  ;;  %v647_v59 = vrot.slane %v556_v5, %v646_v40  ;;  %v654_v2 = vrot.slane %v557_v57, %v653_v56 }
  0xe4   : > { %v1621_v5 = vsub.s32 0, %v1558_v39 }
  0xe5   : > { %vm479_vm13 = vcmp.eq.s32.totalorder %v463_v50, 32  ;;  %vm478_vm14 = vcmp.eq.s32.totalorder %v450_v52, 32  ;;  %v649_v8 = vsel %vm648_vm15, %v647_v59, %v642_v3  ;;  %vm843_vm15 = vcmp.eq.s32.totalorder %v1558_v39, 2 }
  0xe6   : > { %v1256_v60 = vsel %vm479_vm13, 1.0, %v1379_v0  ;;  %v1255_v61 = vsel %vm478_vm14, 1.0, %v1379_v0  ;;  %v656_v11 = vsel %vm655_vm1, %v654_v2, %v649_v8  ;;  %vm841_vm14 = vcmp.eq.s32.totalorder %v1554_v33, 2 }
  0xe7   : > { %v519_v63 = vpack.c.bf16 %v1256_v60, %v1255_v61 }
  0xe9   : > { %v558_v6 = vunpack.c.l.b16 %v519_v63  ;;  %v559_v7 = vunpack.c.h.b16 %v519_v63 }
  0xeb   : > { %v661_v9 = vrot.slane %v558_v6, %v660_v62  ;;  %v668_v10 = vrot.slane %v559_v7, %v667_v1 }
  0xed   : > { %v663_v12 = vsel %vm662_vm2, %v661_v9, %v656_v11 }
  0xee   : > { %v670_v13 = vsel %vm669_vm3, %v668_v10, %v663_v12  ;;  %vm868_vm3 = vcmp.eq.s32.totalorder %v1554_v33, 3 }
  0xef   : > { %v671_v14 = vpack.c.b16 %v670_v13, %v670_v13 }
  0xf1   : > { %1307 = vmatmul.mubr.bf16.vlgmr.msra.gmra.mrb[0].mxu0 %v671_v14 }
 0x1c4   : > { %v755_v15 = vpop.f32.mrb[0].mxu0 }
 0x1c5   : > { %v762_v16 = vshra.s32 %v755_v15, 31  ;;  %v1308_v17 = vpop.f32.mrb[1].mxu0 }
 0x1c6   : > { %v758_v18 = vpop.f32.mrb[2].mxu0 }
 0x1c7   : > { %v763_v19 = vand.u32 2147483647, %v762_v16  ;;  %v1309_v20 = vpop.f32.mrb[3].mxu0 }
 0x1c9   : > { %v764_v21 = vxor.u32 %v763_v19, %v755_v15 }
 0x1cb   : > { %v765_v23 = vand.u32 4294959104, %v764_v21 }
 0x1cd   : > { %v767_v24 = vor.u32 %v766_v22, %v765_v23 }
 0x1cf   : > { %v772_v25 = vsel %vm771_vm4, %v767_v24, 2147483648 }
 0x1d0   : > { %v774_v26 = vshra.s32 %v772_v25, 16  ;;  %v773_v28 = vand.u32 65535, %v772_v25 }
 0x1d2   : > { %v776_v27 = vcvt.s32.f32 %v774_v26  ;;  %v775_v30 = vcvt.s32.f32 %v773_v28 }
 0x1d4   : > { %777 = vmax.xlane.f32.xlu0 %v776_v27 }
 0x261   : > { %v778_v29 = vpop.xlane.xlu0 %777 }
 0x262   : > { %vm779_vm5 = vcmp.eq.f32.partialorder %v776_v27, %v778_v29  ;;  %v784_v32 = vcvt.f32.s32 %v778_v29 }
 0x263   : > { %v780_v31 = vsel %vm779_vm5, %v775_v30, -inf  ;;  %vm870_vm5 = vcmp.eq.s32.totalorder %v1558_v39, 3 }
 0x264   : > { %781 = vmax.xlane.f32.xlu1 %v780_v31  ;;  %v785_v35 = vshll.u32 %v784_v32, 16 }
 0x2f1   : > { %v782_v34 = vpop.xlane.xlu1 %781 }
 0x2f2   : > { %v783_v36 = vcvt.f32.s32 %v782_v34 }
 0x2f4   : > { %v786_v37 = vadd.s32 %v785_v35, %v783_v36 }
 0x2f6   : > { %vm797_vm6 = vcmp.eq.s32.totalorder %v767_v24, %v786_v37  ;;  %v794_v50 = vrot.slane %v786_v37, %v1621_v5  ;;  %v788_v52 = vsel %vm787_vm8, %v786_v37, 2147483648  ;;  %vm895_vm8 = vcmp.eq.s32.totalorder %v1554_v33, 4 }
 0x2f7   : > { %v798_v38 = vsel %vm797_vm6, 2147483648, %v767_v24 }
 0x2f8   : > { %v799_v40 = vsel %vm771_vm4, %v798_v38, 2147483648  ;;  %v795_v55 = vsel %vm789_vm10, %v794_v50, 2147483648 }
 0x2f9   : > { %v801_v41 = vshra.s32 %v799_v40, 16  ;;  %v800_v42 = vand.u32 65535, %v799_v40 }
 0x2fb   : > { %v803_v4 = vcvt.s32.f32 %v801_v41  ;;  %v802_v44 = vcvt.s32.f32 %v800_v42 }
 0x2fd   : > { %804 = vmax.xlane.f32.xlu0 %v803_v4 }
 0x38a   : > { %v805_v43 = vpop.xlane.xlu0 %804 }
 0x38b   : > { %vm806_vm7 = vcmp.eq.f32.partialorder %v803_v4, %v805_v43  ;;  %v811_v46 = vcvt.f32.s32 %v805_v43 }
 0x38c   : > { %v807_v45 = vsel %vm806_vm7, %v802_v44, -inf }
 0x38d   : > { %808 = vmax.xlane.f32.xlu1 %v807_v45  ;;  %v812_v48 = vshll.u32 %v811_v46, 16 }
 0x41a   : > { %v809_v47 = vpop.xlane.xlu1 %808 }
 0x41b   : > { %v810_v49 = vcvt.f32.s32 %v809_v47 }
 0x41d   : > { %v813_v51 = vadd.s32 %v812_v48, %v810_v49 }
 0x41f   : > { %v815_v53 = vsel %vm814_vm9, %v813_v51, %v788_v52  ;;  %v821_v54 = vrot.slane %v813_v51, %v1621_v5  ;;  %vm824_vm12 = vcmp.eq.s32.totalorder %v798_v38, %v813_v51  ;;  %vm897_vm9 = vcmp.eq.s32.totalorder %v1558_v39, 4 }
 0x420   : > { %v825_v56 = vsel %vm824_vm12, 2147483648, %v798_v38  ;;  %vm922_vm12 = vcmp.eq.s32.totalorder %v1554_v33, 5 }
 0x421   : > { %v822_v57 = vsel %vm816_vm11, %v821_v54, %v795_v55  ;;  %v826_v58 = vsel %vm771_vm4, %v825_v56, 2147483648 }
 0x422   : > { %v828_v59 = vshra.s32 %v826_v58, 16  ;;  %v827_v61 = vand.u32 65535, %v826_v58 }
 0x424   : > { %v830_v60 = vcvt.s32.f32 %v828_v59  ;;  %v829_v63 = vcvt.s32.f32 %v827_v61 }
 0x426   : > { %831 = vmax.xlane.f32.xlu0 %v830_v60 }
 0x4b3   : > { %v832_v62 = vpop.xlane.xlu0 %831 }
 0x4b4   : > { %vm833_vm13 = vcmp.eq.f32.partialorder %v830_v60, %v832_v62  ;;  %v838_v2 = vcvt.f32.s32 %v832_v62 }
 0x4b5   : > { %v834_v1 = vsel %vm833_vm13, %v829_v63, -inf  ;;  %vm924_vm13 = vcmp.eq.s32.totalorder %v1558_v39, 5 }
 0x4b6   : > { %835 = vmax.xlane.f32.xlu1 %v834_v1  ;;  %v839_v6 = vshll.u32 %v838_v2, 16 }
 0x543   : > { %v836_v3 = vpop.xlane.xlu1 %835 }
 0x544   : > { %v837_v7 = vcvt.f32.s32 %v836_v3 }
 0x546   : > { %v840_v8 = vadd.s32 %v839_v6, %v837_v7 }
 0x548   : > { %v842_v9 = vsel %vm841_vm14, %v840_v8, %v815_v53  ;;  %v848_v10 = vrot.slane %v840_v8, %v1621_v5  ;;  %vm851_vm1 = vcmp.eq.s32.totalorder %v825_v56, %v840_v8 }
 0x549   : > { %v852_v11 = vsel %vm851_vm1, 2147483648, %v825_v56  ;;  %vm949_vm1 = vcmp.eq.s32.totalorder %v1554_v33, 6 }
 0x54a   : > { %v849_v12 = vsel %vm843_vm15, %v848_v10, %v822_v57  ;;  %v853_v13 = vsel %vm771_vm4, %v852_v11, 2147483648 }
 0x54b   : > { %v855_v14 = vshra.s32 %v853_v13, 16  ;;  %v854_v16 = vand.u32 65535, %v853_v13 }
 0x54d   : > { %v857_v15 = vcvt.s32.f32 %v855_v14  ;;  %v856_v18 = vcvt.s32.f32 %v854_v16 }
 0x54f   : > { %858 = vmax.xlane.f32.xlu0 %v857_v15 }
 0x5dc   : > { %v859_v17 = vpop.xlane.xlu0 %858 }
 0x5dd   : > { %vm860_vm2 = vcmp.eq.f32.partialorder %v857_v15, %v859_v17  ;;  %v865_v20 = vcvt.f32.s32 %v859_v17 }
 0x5de   : > { %v861_v19 = vsel %vm860_vm2, %v856_v18, -inf  ;;  %vm951_vm2 = vcmp.eq.s32.totalorder %v1558_v39, 6 }
 0x5df   : > { %862 = vmax.xlane.f32.xlu1 %v861_v19  ;;  %v866_v22 = vshll.u32 %v865_v20, 16 }
 0x66c   : > { %v863_v21 = vpop.xlane.xlu1 %862 }
 0x66d   : > { %v864_v23 = vcvt.f32.s32 %v863_v21 }
 0x66f   : > { %v867_v24 = vadd.s32 %v866_v22, %v864_v23 }
 0x671   : > { %v869_v25 = vsel %vm868_vm3, %v867_v24, %v842_v9  ;;  %v875_v26 = vrot.slane %v867_v24, %v1621_v5  ;;  %vm878_vm6 = vcmp.eq.s32.totalorder %v852_v11, %v867_v24 }
 0x672   : > { %v879_v27 = vsel %vm878_vm6, 2147483648, %v852_v11  ;;  %vm976_vm6 = vcmp.eq.s32.totalorder %v1554_v33, 7 }
 0x673   : > { %v876_v28 = vsel %vm870_vm5, %v875_v26, %v849_v12  ;;  %v880_v29 = vsel %vm771_vm4, %v879_v27, 2147483648 }
 0x674   : > { %v882_v30 = vshra.s32 %v880_v29, 16  ;;  %v881_v32 = vand.u32 65535, %v880_v29 }
 0x676   : > { %v884_v31 = vcvt.s32.f32 %v882_v30  ;;  %v883_v35 = vcvt.s32.f32 %v881_v32 }
 0x678   : > { %885 = vmax.xlane.f32.xlu0 %v884_v31 }
 0x705   : > { %v886_v34 = vpop.xlane.xlu0 %885 }
 0x706   : > { %vm887_vm7 = vcmp.eq.f32.partialorder %v884_v31, %v886_v34  ;;  %v892_v37 = vcvt.f32.s32 %v886_v34 }
 0x707   : > { %v888_v36 = vsel %vm887_vm7, %v883_v35, -inf  ;;  %vm978_vm7 = vcmp.eq.s32.totalorder %v1558_v39, 7 }
 0x708   : > { %889 = vmax.xlane.f32.xlu1 %v888_v36  ;;  %v893_v40 = vshll.u32 %v892_v37, 16 }
 0x795   : > { %v890_v38 = vpop.xlane.xlu1 %889 }
 0x796   : > { %v891_v41 = vcvt.f32.s32 %v890_v38 }
 0x798   : > { %v894_v4 = vadd.s32 %v893_v40, %v891_v41 }
 0x79a   : > { %v896_v42 = vsel %vm895_vm8, %v894_v4, %v869_v25  ;;  %v902_v43 = vrot.slane %v894_v4, %v1621_v5  ;;  %vm905_vm10 = vcmp.eq.s32.totalorder %v879_v27, %v894_v4 }
 0x79b   : > { %v906_v44 = vsel %vm905_vm10, 2147483648, %v879_v27  ;;  %vm1003_vm10 = vcmp.eq.s32.totalorder %v1554_v33, 8 }
 0x79c   : > { %v903_v45 = vsel %vm897_vm9, %v902_v43, %v876_v28  ;;  %v907_v46 = vsel %vm771_vm4, %v906_v44, 2147483648 }
 0x79d   : > { %v909_v47 = vshra.s32 %v907_v46, 16  ;;  %v908_v49 = vand.u32 65535, %v907_v46 }
 0x79f   : > { %v911_v48 = vcvt.s32.f32 %v909_v47  ;;  %v910_v51 = vcvt.s32.f32 %v908_v49 }
 0x7a1   : > { %912 = vmax.xlane.f32.xlu0 %v911_v48 }
 0x82e   : > { %v913_v50 = vpop.xlane.xlu0 %912 }
 0x82f   : > { %vm914_vm11 = vcmp.eq.f32.partialorder %v911_v48, %v913_v50  ;;  %v919_v53 = vcvt.f32.s32 %v913_v50 }
 0x830   : > { %v915_v52 = vsel %vm914_vm11, %v910_v51, -inf }
 0x831   : > { %916 = vmax.xlane.f32.xlu1 %v915_v52  ;;  %v920_v55 = vshll.u32 %v919_v53, 16 }
 0x8be   : > { %v917_v54 = vpop.xlane.xlu1 %916 }
 0x8bf   : > { %v918_v56 = vcvt.f32.s32 %v917_v54 }
 0x8c1   : > { %v921_v57 = vadd.s32 %v920_v55, %v918_v56  ;;  %v1659_v56 = vadd.s32 8, %v1558_v39 }
 0x8c3   : > { %v923_v58 = vsel %vm922_vm12, %v921_v57, %v896_v42  ;;  %v929_v59 = vrot.slane %v921_v57, %v1621_v5  ;;  %vm932_vm14 = vcmp.eq.s32.totalorder %v906_v44, %v921_v57 }
 0x8c4   : > { %v933_v60 = vsel %vm932_vm14, 2147483648, %v906_v44  ;;  %vm1006_vm14 = vcmp.eq.s32.totalorder %v1659_v56, 8 }
 0x8c5   : > { %v930_v61 = vsel %vm924_vm13, %v929_v59, %v903_v45  ;;  %v934_v62 = vsel %vm771_vm4, %v933_v60, 2147483648  ;;  %vm1030_vm13 = vcmp.eq.s32.totalorder %v1554_v33, 9 }
 0x8c6   : > { %v936_v63 = vshra.s32 %v934_v62, 16  ;;  %v935_v2 = vand.u32 65535, %v934_v62 }
 0x8c8   : > { %v938_v1 = vcvt.s32.f32 %v936_v63  ;;  %v937_v6 = vcvt.s32.f32 %v935_v2 }
 0x8ca   : > { %939 = vmax.xlane.f32.xlu0 %v938_v1 }
 0x957   : > { %v940_v3 = vpop.xlane.xlu0 %939 }
 0x958   : > { %vm941_vm15 = vcmp.eq.f32.partialorder %v938_v1, %v940_v3  ;;  %v946_v8 = vcvt.f32.s32 %v940_v3 }
 0x959   : > { %v942_v7 = vsel %vm941_vm15, %v937_v6, -inf  ;;  %vm1033_vm15 = vcmp.eq.s32.totalorder %v1659_v56, 9 }
 0x95a   : > { %943 = vmax.xlane.f32.xlu1 %v942_v7  ;;  %v947_v10 = vshll.u32 %v946_v8, 16  ;;  %v1354_v8 = vld [vmem:[%s1749_s1 + $0x10] sm:$0xff] }
 0x9e7   : > { %v944_v9 = vpop.xlane.xlu1 %943 }
 0x9e8   : > { %v945_v11 = vcvt.f32.s32 %v944_v9  ;;  %v1089_v9 = vcvt.s32.f32 %v1354_v8 }
 0x9ea   : > { %v948_v12 = vadd.s32 %v947_v10, %v945_v11  ;;  %v1355_v10 = vld [vmem:[%s1749_s1] sm:$0xff] }
 0x9eb   : > { %v1087_v11 = vcvt.s32.f32 %v1355_v10 }
 0x9ec   : > { %v950_v13 = vsel %vm949_vm1, %v948_v12, %v923_v58  ;;  %v956_v14 = vrot.slane %v948_v12, %v1621_v5  ;;  %vm959_vm3 = vcmp.eq.s32.totalorder %v933_v60, %v948_v12  ;;  %v1356_v12 = vld [vmem:[%s1749_s1 + $0x8] sm:$0xff] }
 0x9ed   : > { %v960_v15 = vsel %vm959_vm3, 2147483648, %v933_v60  ;;  %vm1060_vm3 = vcmp.eq.s32.totalorder %v1659_v56, 10  ;;  %v1381_v56 = vmov 1.0|1.0  }
 0x9ee   : > { %v961_v16 = vsel %vm771_vm4, %v960_v15, 2147483648  ;;  %v957_v17 = vsel %vm951_vm2, %v956_v14, %v930_v61  ;;  %v1357_v14 = vld [vmem:[%s1749_s1 + $0x18] sm:$0xff]  ;;  %vm1057_vm2 = vcmp.eq.s32.totalorder %v1554_v33, 10 }
 0x9ef   : > { %v963_v18 = vshra.s32 %v961_v16, 16  ;;  %v962_v20 = vand.u32 65535, %v961_v16 }
 0x9f1   : > { %v965_v19 = vcvt.s32.f32 %v963_v18  ;;  %v964_v22 = vcvt.s32.f32 %v962_v20  ;;  %v1358_v18 = vld [vmem:[%s1749_s1 + $0x20] sm:$0xff]  ;;  %v1359_v20 = vld [vmem:[%s1749_s1 + $0x28] sm:$0xff] }
 0x9f3   : > { %966 = vmax.xlane.f32.xlu0 %v965_v19 }
 0xa80   : > { %v967_v21 = vpop.xlane.xlu0 %966 }
 0xa81   : > { %vm968_vm5 = vcmp.eq.f32.partialorder %v965_v19, %v967_v21  ;;  %v973_v24 = vcvt.f32.s32 %v967_v21  ;;  %v1091_v19 = vcvt.s32.f32 %v1358_v18  ;;  %v1092_v21 = vcvt.s32.f32 %v1359_v20 }
 0xa82   : > { %v969_v23 = vsel %vm968_vm5, %v964_v22, -inf  ;;  %vm1073_vm5 = vcmp.lt.s32.totalorder %v1554_v33, 11 }
 0xa83   : > { %970 = vmax.xlane.f32.xlu1 %v969_v23  ;;  %v974_v26 = vshll.u32 %v973_v24, 16  ;;  %v1105_v22 = vpack.c.bf16 %v1092_v21, %v1091_v19  ;;  %v1360_v23 = vld [vmem:[%s1749_s1 + $0x30] sm:$0xff] }
 0xa84   : > { %v1093_v24 = vcvt.s32.f32 %v1360_v23 }
 0xb10   : > { %v971_v25 = vpop.xlane.xlu1 %970 }
 0xb11   : > { %v972_v27 = vcvt.f32.s32 %v971_v25  ;;  %v1361_v25 = vld [vmem:[%s1749_s1 + $0x38] sm:$0xff] }
 0xb13   : > { %v975_v28 = vadd.s32 %v974_v26, %v972_v27  ;;  %v1094_v26 = vcvt.s32.f32 %v1361_v25 }
 0xb15   : > { %v977_v29 = vsel %vm976_vm6, %v975_v28, %v950_v13  ;;  %v983_v30 = vrot.slane %v975_v28, %v1621_v5  ;;  %vm986_vm8 = vcmp.eq.s32.totalorder %v960_v15, %v975_v28  ;;  %v1088_v13 = vcvt.s32.f32 %v1356_v12  ;;  %v1362_v28 = vld [vmem:[%s1749_s1 + $0x40] sm:$0xff] }
 0xb16   : > { %v987_v31 = vsel %vm986_vm8, 2147483648, %v960_v15  ;;  %v1090_v15 = vcvt.s32.f32 %v1357_v14  ;;  %v1106_v27 = vpack.c.bf16 %v1094_v26, %v1093_v24 }
 0xb17   : > { %v988_v32 = vsel %vm771_vm4, %v987_v31, 2147483648  ;;  %v1654_v34 = vsel %vm978_vm7, %v983_v30, %v957_v17  ;;  %v1103_v16 = vpack.c.bf16 %v1088_v13, %v1087_v11  ;;  %v1363_v30 = vld [vmem:[%s1749_s1 + $0x48] sm:$0xff] }
 0xb18   : > { %v990_v35 = vshra.s32 %v988_v32, 16  ;;  %v989_v37 = vand.u32 65535, %v988_v32  ;;  %v1104_v17 = vpack.c.bf16 %v1090_v15, %v1089_v9 }
 0xb19   : > { %1311 = vmatpush3.bf16.msra.mxu1 %v1103_v16 }
 0xb1a   : > { %v992_v36 = vcvt.s32.f32 %v990_v35  ;;  %v991_v40 = vcvt.s32.f32 %v989_v37  ;;  %1312 = vmatprep.subr.bf16.mxu1 %v1379_v0 }
 0xb1c   : > { %993 = vmax.xlane.f32.xlu0 %v992_v36 }
 0xb1d   : > { %1313 = vmatpush3.bf16.msra.mxu1 %v1104_v17 }
 0xb1e   : > { %1314 = vmatprep.subr.bf16.mxu1 %v1379_v0 }
 0xb21   : > { %1315 = vmatpush3.bf16.msra.mxu1 %v1105_v22 }
 0xb22   : > { %1316 = vmatprep.subr.bf16.mxu1 %v1379_v0 }
 0xb25   : > { %1317 = vmatpush3.bf16.msra.mxu1 %v1106_v27 }
 0xb26   : > { %1318 = vmatprep.subr.bf16.mxu1 %v1379_v0 }
 0xba9   : > { %v994_v38 = vpop.xlane.xlu0 %993 }
 0xbaa   : > { %vm995_vm9 = vcmp.eq.f32.partialorder %v992_v36, %v994_v38  ;;  %v1000_v4 = vcvt.f32.s32 %v994_v38 }
 0xbab   : > { %v996_v41 = vsel %vm995_vm9, %v991_v40, -inf  ;;  %v1364_v40 = vld [vmem:[%s1749_s1 + $0x50] sm:$0xff] }
 0xbac   : > { %997 = vmax.xlane.f32.xlu1 %v996_v41  ;;  %v1001_v43 = vshll.u32 %v1000_v4, 16  ;;  %v1097_v41 = vcvt.s32.f32 %v1364_v40  ;;  %v1365_v4 = vld [vmem:[%s1749_s1 + $0x58] sm:$0xff] }
 0xc39   : > { %v998_v42 = vpop.xlane.xlu1 %997 }
 0xc3a   : > { %v999_v44 = vcvt.f32.s32 %v998_v42  ;;  %v1098_v42 = vcvt.s32.f32 %v1365_v4 }
 0xc3c   : > { %v1002_v45 = vadd.s32 %v1001_v43, %v999_v44  ;;  %v1108_v43 = vpack.c.bf16 %v1098_v42, %v1097_v41  ;;  %v1366_v44 = vld [vmem:[%s1749_s1 + $0x60] sm:$0xff] }
 0xc3e   : > { %v1004_v46 = vsel %vm1003_vm10, %v1002_v45, %v977_v29  ;;  %vm1013_vm11 = vcmp.eq.s32.totalorder %v987_v31, %v1002_v45  ;;  %v1010_v60 = vrot.slane %v1002_v45, %v1621_v5  ;;  %v1095_v29 = vcvt.s32.f32 %v1362_v28 }
 0xc3f   : > { %v1014_v47 = vsel %vm1013_vm11, 2147483648, %v987_v31  ;;  %v1096_v31 = vcvt.s32.f32 %v1363_v30  ;;  %v1099_v45 = vcvt.s32.f32 %v1366_v44 }
 0xc40   : > { %v1015_v48 = vsel %vm771_vm4, %v1014_v47, 2147483648  ;;  %v1012_v1 = vsel %vm1006_vm14, %v1010_v60, 2147483648  ;;  %v1076_v60 = vand.u32 8191, %v1654_v34 }
 0xc41   : > { %v1017_v49 = vshra.s32 %v1015_v48, 16  ;;  %v1016_v51 = vand.u32 65535, %v1015_v48  ;;  %v1107_v32 = vpack.c.bf16 %v1096_v31, %v1095_v29 }
 0xc43   : > { %v1019_v50 = vcvt.s32.f32 %v1017_v49  ;;  %v1018_v53 = vcvt.s32.f32 %v1016_v51  ;;  %1319 = vmatpush3.bf16.msra.mxu1 %v1107_v32  ;;  %v1368_v49 = vld [vmem:[%s1749_s1 + $0x70] sm:$0xff]  ;;  %v1369_v51 = vld [vmem:[%s1749_s1 + $0x78] sm:$0xff] }
 0xc44   : > { %1320 = vmatprep.subr.bf16.mxu1 %v1379_v0 }
 0xc45   : > { %1020 = vmax.xlane.f32.xlu0 %v1019_v50 }
 0xc47   : > { %1321 = vmatpush3.bf16.msra.mxu1 %v1108_v43 }
 0xc48   : > { %1322 = vmatprep.subr.bf16.mxu1 %v1379_v0 }
 0xcd2   : > { %v1021_v52 = vpop.xlane.xlu0 %1020 }
 0xcd3   : > { %vm1022_vm12 = vcmp.eq.f32.partialorder %v1019_v50, %v1021_v52  ;;  %v1027_v55 = vcvt.f32.s32 %v1021_v52  ;;  %v1101_v50 = vcvt.s32.f32 %v1368_v49  ;;  %v1102_v52 = vcvt.s32.f32 %v1369_v51 }
 0xcd4   : > { %v1023_v54 = vsel %vm1022_vm12, %v1018_v53, -inf }
 0xcd5   : > { %1024 = vmax.xlane.f32.xlu1 %v1023_v54  ;;  %v1028_v58 = vshll.u32 %v1027_v55, 16  ;;  %v1110_v53 = vpack.c.bf16 %v1102_v52, %v1101_v50 }
 0xd62   : > { %v1025_v57 = vpop.xlane.xlu1 %1024 }
 0xd63   : > { %v1026_v59 = vcvt.f32.s32 %v1025_v57 }
 0xd65   : > { %v1029_v61 = vadd.s32 %v1028_v58, %v1026_v59 }
 0xd67   : > { %v1665_v62 = vsel %vm1030_vm13, %v1029_v61, %v1004_v46  ;;  %v1037_v63 = vrot.slane %v1029_v61, %v1621_v5  ;;  %vm1040_vm1 = vcmp.eq.s32.totalorder %v1014_v47, %v1029_v61  ;;  %v1367_v46 = vld [vmem:[%s1749_s1 + $0x68] sm:$0xff] }
 0xd68   : > { %v1041_v39 = vsel %vm1040_vm1, 2147483648, %v1014_v47  ;;  %v1100_v47 = vcvt.s32.f32 %v1367_v46 }
 0xd69   : > { %v1042_v2 = vsel %vm771_vm4, %v1041_v39, 2147483648  ;;  %v1669_v3 = vsel %vm1033_vm15, %v1037_v63, %v1012_v1 }
 0xd6a   : > { %v1044_v6 = vshra.s32 %v1042_v2, 16  ;;  %v1043_v35 = vand.u32 65535, %v1042_v2  ;;  %v1109_v48 = vpack.c.bf16 %v1100_v47, %v1099_v45 }
 0xd6c   : > { %v1046_v7 = vcvt.s32.f32 %v1044_v6  ;;  %v1045_v37 = vcvt.s32.f32 %v1043_v35  ;;  %1323 = vmatpush3.bf16.msra.mxu1 %v1109_v48  ;;  %v1078_v6 = vsub.s32 8191, %v1076_v60 }
 0xd6d   : > { %1324 = vmatprep.subr.bf16.mxu1 %v1379_v0 }
 0xd6e   : > { %1047 = vmax.xlane.f32.xlu0 %v1046_v7  ;;  %vm1080_vm7 = vcmp.eq.s32.totalorder %v1078_v6, %v1554_v33 }
 0xd70   : > { %1325 = vmatpush3.bf16.msra.mxu1 %v1110_v53 }
 0xdfb   : > { %v1048_v36 = vpop.xlane.xlu0 %1047 }
 0xdfc   : > { %vm1049_vm4 = vcmp.eq.f32.partialorder %v1046_v7, %v1048_v36  ;;  %v1054_v54 = vcvt.f32.s32 %v1048_v36 }
 0xdfd   : > { %v1050_v38 = vsel %vm1049_vm4, %v1045_v37, -inf }
 0xdfe   : > { %1051 = vmax.xlane.f32.xlu1 %v1050_v38  ;;  %v1055_v57 = vshll.u32 %v1054_v54, 16 }
 0xe8b   : > { %v1052_v55 = vpop.xlane.xlu1 %1051 }
 0xe8c   : > { %v1053_v58 = vcvt.f32.s32 %v1052_v55 }
 0xe8e   : > { %v1056_v59 = vadd.s32 %v1055_v57, %v1053_v58 }
 0xe90   : > { %v1058_v61 = vsel %vm1057_vm2, %v1056_v59, %v1665_v62  ;;  %v1064_v63 = vrot.slane %v1056_v59, %v1621_v5 }
 0xe91   : > { %v1067_v1 = vand.u32 4294959104, %v1058_v61 }
 0xe92   : > { %v1066_v0 = vsel %vm1060_vm3, %v1064_v63, %v1669_v3 }
 0xe93   : > { %v1069_v39 = vor.u32 8191, %v1067_v1  ;;  %v1077_v2 = vand.u32 8191, %v1066_v0  ;;  %vm1068_vm6 = vcmp.lt.s32.totalorder %v1067_v1, 0 }
 0xe95   : > { %v1070_v7 = vxor.u32 2147483647, %v1069_v39  ;;  %v1079_v8 = vsub.s32 8191, %v1077_v2 }
 0xe97   : > { %v1071_v34 = vsel %vm1068_vm6, %v1070_v7, %v1067_v1  ;;  %vm1081_vm8 = vcmp.eq.s32.totalorder %v1079_v8, %v1554_v33 }
 0xe98   : > { %v1074_v5 = vsel %vm1073_vm5, %v1071_v34, 0.0  ;;  %vm1267_vm9 = vmpackc.low %vm1081_vm8, %vm1080_vm7 }
 0xe99   : > { %1075 = vst [vmem:[%s200_s30] sm:$0x1] %v1074_v5  ;;  %1327 = vmatmul.mubr.msk.bf16.vlgmr.msra.gmra.mrb[0].mxu1 %vm1267_vm9, %v1381_v56 }
 0xf6c   : > { %v1145_v62 = vpop.f32.mrb[0].mxu1 }
 0xf6d   : > { %v1330_v3 = vtrunc.f32 %v1145_v62  ;;  %v1328_v9 = vpop.f32.mrb[1].mxu1 }
 0xf6e   : > { %v1148_v10 = vpop.f32.mrb[2].mxu1 }
 0xf6f   : > { %v1331_v11 = vcvt.f32.s32 %v1330_v3  ;;  %v1332_v12 = vtrunc.f32 %v1148_v10  ;;  %v1329_v13 = vpop.f32.mrb[3].mxu1 }
 0xf71   : > { %1154 = vst.msk [vmem:[%s197_s8] sm:$0xff] %vm255_vm0, %v1331_v11  ;;  %v1333_v33 = vcvt.f32.s32 %v1332_v12 }
 0xf73   : > { %1155 = vst.msk [vmem:[%s197_s8 + $0x8] sm:$0xff] %vm255_vm0, %v1333_v33 }
 0xf74 PF: > { %s15_s15 = sadd.s32 1, %s1376_s15  }
 0xf75   : > { %p12_p4 = scmp.ge.s32.totalorder %s15_s15, 6  }
 0xf77   :  { %14 = sbr.rel (!%p12_p4) target bundleno = 1 (0x1), region = 74 }

</bundles_post_ra>
